<compile_context>
chip_gen: v7x
topology: tpu7x:2x2x1
jax: 0.10.0
libtpu: 0.0.40
codegen_flags: <defaults>
</compile_context>

<pallas_src>
import functools

import jax
import jax.numpy as jnp
from jax.experimental import pallas as pl
from jax.experimental.pallas import tpu as pltpu


# ----------------------------- Pallas kernel -----------------------------

def sage_fused_kernel(a_ref, xp_ref, w1l_ref, w1r_ref, b1_ref,
                      w2l_ref, w2r_ref, b2_ref,
                      x1_ref, x2_ref, *, tm, norm_eps):
    i = pl.program_id(0)
    row0 = pl.multiple_of(i * tm, tm)

    a_blk = a_ref[...]                    # (tm, n_pad)     mean-adjacency row panel
    xp_all = xp_ref[...]                  # (n_pad, p_pad)  packed [x | transition(x)]
    xp_blk = xp_ref[pl.ds(row0, tm), :]   # (tm, p_pad)     this panel's own rows (root)

    # ONE aggregation matmul serves both convs:
    #   agg[:, 0:F]  = mean-aggregated x              (conv1)
    #   agg[:, F:2F] = mean-aggregated transition(x)  (conv2)
    agg = jnp.dot(a_blk, xp_all, preferred_element_type=jnp.float32)   # (tm, p_pad) f32

    eps2 = norm_eps * norm_eps

    # ---- conv1: lin_l(agg) + lin_r(x) + b1 -> L2 normalize ----
    # (W1_l / W1_r occupy packed rows 0:F; everything else is zero.)
    h1 = (jnp.dot(agg, w1l_ref[...], preferred_element_type=jnp.float32)
          + jnp.dot(xp_blk, w1r_ref[...], preferred_element_type=jnp.float32)
          + b1_ref[...])
    ss1 = jnp.sum(h1 * h1, axis=-1, keepdims=True)
    x1_ref[...] = (h1 * jax.lax.rsqrt(jnp.maximum(ss1, eps2))).astype(x1_ref.dtype)

    # ---- conv2 on transition(x): W2_l / W2_r occupy packed rows F:2F ----
    h2 = (jnp.dot(agg, w2l_ref[...], preferred_element_type=jnp.float32)
          + jnp.dot(xp_blk, w2r_ref[...], preferred_element_type=jnp.float32)
          + b2_ref[...])
    ss2 = jnp.sum(h2 * h2, axis=-1, keepdims=True)
    x2_ref[...] = (h2 * jax.lax.rsqrt(jnp.maximum(ss2, eps2))).astype(x2_ref.dtype)


# ----------------------------- wrapper -----------------------------

def _round_up(x, m):
    return ((x + m - 1) // m) * m


def _pad2(a, rows, cols, dtype):
    a = jnp.asarray(a)
    out = jnp.zeros((rows, cols), dtype)
    return out.at[: a.shape[0], : a.shape[1]].set(a.astype(dtype))


def _vmem_need(tm, n_pad, p_pad, h_pad, itemsize):
    # Worst-case: every operand double-buffered by the auto-pipeline.
    return (2 * tm * n_pad * itemsize        # A row panel
            + 2 * n_pad * p_pad * itemsize   # resident packed X
            + 2 * 4 * p_pad * h_pad * 4      # f32 weights
            + 2 * 2 * tm * h_pad * 4         # two f32 outputs
            + (1 << 20))                     # headroom (biases, internals)


def _pick_row_tile(n, p_pad, h_pad, itemsize, budget=32 << 20):
    """Largest row tile whose working set fits a conservative cross-gen VMEM budget."""
    n128 = _round_up(n, 128)
    if n128 <= 512 and _vmem_need(n128, n128, p_pad, h_pad, itemsize) <= budget:
        return n128                      # whole graph as a single lane-dense panel
    for tm in (512, 256, 128, 64, 32, 16, 8):
        if _vmem_need(tm, _round_up(n, tm), p_pad, h_pad, itemsize) <= budget:
            return tm
    return 8


def sage_forward(params, x, a_mean, *, return_all_emb=False, row_tile=None,
                 compute_dtype=jnp.bfloat16, bn_eps=1e-5, norm_eps=1e-12):
    n, f = x.shape
    h = params["w1_l"].shape[1]
    # The literal module applies BatchNorm1d(hidden) to raw x and feeds that to conv2.
    assert f == h == params["bn_gamma"].shape[0] == params["w2_l"].shape[0], \
        "SAGE forward (as written) requires num_features == hidden"

    LANE = 128
    h_pad = _round_up(h, LANE)
    p_pad = _round_up(2 * f, LANE)       # packed feature width: [x | transition(x)]
    cdt = jnp.dtype(compute_dtype)
    itemsize = cdt.itemsize

    if row_tile is None:
        row_tile = _pick_row_tile(n, p_pad, h_pad, itemsize)
    tm = row_tile
    assert tm % 8 == 0
    n_pad = _round_up(n, tm)

    # Fold eval-mode BatchNorm into a single scale/shift and precompute the transition
    # t = relu(x) * scale + shift ONCE here (instead of per grid step inside the kernel).
    scale = (params["bn_gamma"] / jnp.sqrt(params["bn_var"] + bn_eps)).astype(jnp.float32)
    shift = (params["bn_beta"] - params["bn_mean"] * scale).astype(jnp.float32)
    xf = x.astype(jnp.float32)
    t = jnp.maximum(xf, 0.0) * scale + shift

    # Packed features: columns [0:F) = x, [F:2F) = transition(x), padded rows stay zero.
    xp = jnp.zeros((n_pad, p_pad), cdt)
    xp = xp.at[:n, :f].set(xf.astype(cdt))
    xp = xp.at[:n, f:2 * f].set(t.astype(cdt))

    a_p = _pad2(a_mean, n_pad, n_pad, cdt)

    # Weights stay f32 (tiny; keeps the small matmuls exact).  Conv1 weights occupy
    # packed rows 0:F, conv2 weights occupy rows F:2F.
    w1l = _pad2(params["w1_l"], p_pad, h_pad, jnp.float32)
    w1r = _pad2(params["w1_r"], p_pad, h_pad, jnp.float32)
    w2l = jnp.zeros((p_pad, h_pad), jnp.float32).at[f:2 * f, :h].set(
        params["w2_l"].astype(jnp.float32))
    w2r = jnp.zeros((p_pad, h_pad), jnp.float32).at[f:2 * f, :h].set(
        params["w2_r"].astype(jnp.float32))
    b1 = _pad2(params["b1"].reshape(1, -1), 1, h_pad, jnp.float32)
    b2 = _pad2(params["b2"].reshape(1, -1), 1, h_pad, jnp.float32)

    vmem_need = _vmem_need(tm, n_pad, p_pad, h_pad, itemsize)
    # Explicit scoped-VMEM limit: at least 32 MiB (>= need here), capped well under
    # v7x's 64 MiB physical per-TC VMEM.
    vmem_limit = int(min(max(vmem_need + (4 << 20), 32 << 20), 48 << 20))

    cost = pl.CostEstimate(
        flops=2 * n_pad * n_pad * p_pad + 8 * n_pad * p_pad * h_pad,
        transcendentals=2 * n_pad,
        bytes_accessed=int(itemsize) * (n_pad * n_pad + n_pad * p_pad)
        + 4 * (4 * p_pad * h_pad + 2 * h_pad + 2 * n_pad * h_pad),
    )

    kernel = functools.partial(sage_fused_kernel, tm=tm, norm_eps=norm_eps)
    x1_p, x2_p = pl.pallas_call(
        kernel,
        grid=(n_pad // tm,),
        in_specs=[
            pl.BlockSpec((tm, n_pad), lambda i: (i, 0)),       # A_mean row panel
            pl.BlockSpec((n_pad, p_pad), lambda i: (0, 0)),    # packed [x | t] (resident)
            pl.BlockSpec((p_pad, h_pad), lambda i: (0, 0)),    # W1_l (rows 0:F)
            pl.BlockSpec((p_pad, h_pad), lambda i: (0, 0)),    # W1_r (rows 0:F)
            pl.BlockSpec((1, h_pad), lambda i: (0, 0)),        # b1
            pl.BlockSpec((p_pad, h_pad), lambda i: (0, 0)),    # W2_l (rows F:2F)
            pl.BlockSpec((p_pad, h_pad), lambda i: (0, 0)),    # W2_r (rows F:2F)
            pl.BlockSpec((1, h_pad), lambda i: (0, 0)),        # b2
        ],
        out_specs=(
            pl.BlockSpec((tm, h_pad), lambda i: (i, 0)),
            pl.BlockSpec((tm, h_pad), lambda i: (i, 0)),
        ),
        out_shape=(
            jax.ShapeDtypeStruct((n_pad, h_pad), jnp.float32),
            jax.ShapeDtypeStruct((n_pad, h_pad), jnp.float32),
        ),
        compiler_params=pltpu.CompilerParams(
            dimension_semantics=("parallel",),   # shards row panels across v7x's 2 TCs
            vmem_limit_bytes=vmem_limit,
        ),
        cost_estimate=cost,
    )(a_p, xp, w1l, w1r, b1, w2l, w2r, b2)

    x1 = x1_p[:n, :h]
    x2 = x2_p[:n, :h]
    return (x1, x2) if return_all_emb else x2


# ----------------------------- glue (plain JAX) -----------------------------

def build_mean_adjacency(edge_index, num_nodes):
    """Dense row-normalized adjacency: row i averages x_j over incoming edges j->i.
    Matches PyG SAGEConv aggr='mean' (no self loops; zero in-degree rows -> 0)."""
    src, dst = edge_index[0], edge_index[1]
    a = jnp.zeros((num_nodes, num_nodes), jnp.float32).at[dst, src].add(1.0)
    deg = a.sum(axis=1, keepdims=True)
    return jnp.where(deg > 0, a / jnp.maximum(deg, 1.0), 0.0)


def glorot(key, shape):
    fan_in, fan_out = shape
    limit = jnp.sqrt(6.0 / (fan_in + fan_out))
    return jax.random.uniform(key, shape, jnp.float32, -limit, limit)


# ----------------------------- reference (pure JAX) -----------------------------

def sage_reference(params, x, a_mean, *, bn_eps=1e-5, norm_eps=1e-12):
    hp = jax.lax.Precision.HIGHEST

    def conv(xin, wl, wr, b):
        agg = jnp.dot(a_mean, xin, precision=hp)
        out = jnp.dot(agg, wl, precision=hp) + jnp.dot(xin, wr, precision=hp) + b
        nrm = jnp.sqrt(jnp.sum(out * out, axis=-1, keepdims=True))
        return out / jnp.maximum(nrm, norm_eps)

    x1 = conv(x, params["w1_l"], params["w1_r"], params["b1"])
    t = jnp.maximum(x, 0.0)
    t = ((t - params["bn_mean"])
         * (params["bn_gamma"] / jnp.sqrt(params["bn_var"] + bn_eps))
         + params["bn_beta"])
    x2 = conv(t, params["w2_l"], params["w2_r"], params["b2"])
    return x1, x2


# ----------------------------- main -----------------------------

if __name__ == "__main__":
    NUM_NODES = 200
    NUM_FEATURES = 32   # must equal HIDDEN: the module's BatchNorm1d(hidden) runs on raw x
    HIDDEN = 32

    key = jax.random.PRNGKey(0)
    kx, k1l, k1r, k2l, k2r = jax.random.split(key, 5)

    x = jax.random.normal(kx, (NUM_NODES, NUM_FEATURES), jnp.float32)

    # Deterministic ring graph, both directions -> (2, 2N) edge_index (src, dst).
    src = jnp.arange(NUM_NODES, dtype=jnp.int32)
    dst = (src + 1) % NUM_NODES
    edge_index = jnp.stack(
        [jnp.concatenate([src, dst]), jnp.concatenate([dst, src])], axis=0
    )

    a_mean = build_mean_adjacency(edge_index, NUM_NODES)

    params = {
        "w1_l": glorot(k1l, (NUM_FEATURES, HIDDEN)),   # SAGEConv1 lin_l (has bias)
        "w1_r": glorot(k1r, (NUM_FEATURES, HIDDEN)),   # SAGEConv1 lin_r (no bias)
        "b1": jnp.zeros((HIDDEN,), jnp.float32),
        "w2_l": glorot(k2l, (HIDDEN, HIDDEN)),         # SAGEConv2 lin_l
        "w2_r": glorot(k2r, (HIDDEN, HIDDEN)),         # SAGEConv2 lin_r
        "b2": jnp.zeros((HIDDEN,), jnp.float32),
        "bn_gamma": jnp.ones((HIDDEN,), jnp.float32),  # BatchNorm1d defaults (eval mode)
        "bn_beta": jnp.zeros((HIDDEN,), jnp.float32),
        "bn_mean": jnp.zeros((HIDDEN,), jnp.float32),
        "bn_var": jnp.ones((HIDDEN,), jnp.float32),
    }

    # Module default call: returns x2 only (bf16 A / packed-X stream by default).
    out = sage_forward(params, x, a_mean)
    out = jax.block_until_ready(out)
    assert out.shape == (NUM_NODES, HIDDEN)

    x1_ref, x2_ref = sage_reference(params, x, a_mean)

    # bf16-stream path (default): tolerance appropriate to bf16 operands on the
    # dominant aggregation matmul; f32 accumulation + f32 weights keep it tight-ish.
    x1_b, x2_b = sage_forward(params, x, a_mean, return_all_emb=True)
    assert jnp.allclose(out, x2_b), "default call must match return_all_emb x2"
    assert jnp.allclose(x1_b, x1_ref, atol=1e-2, rtol=1e-2), "x1 (bf16) mismatch vs ref"
    assert jnp.allclose(x2_b, x2_ref, atol=1e-2, rtol=1e-2), "x2 (bf16) mismatch vs ref"

    # f32 path: exact parity with the f32 JAX reference.
    x1_f, x2_f = sage_forward(params, x, a_mean, return_all_emb=True,
                              compute_dtype=jnp.float32)
    assert jnp.allclose(x1_f, x1_ref, atol=1e-4, rtol=1e-3), "x1 (f32) mismatch vs ref"
    assert jnp.allclose(x2_f, x2_ref, atol=1e-4, rtol=1e-3), "x2 (f32) mismatch vs ref"

    print("KERNEL_OK")
</pallas_src>

<mosaic_0001>
module attributes {stable_mosaic.version = 11 : i64} {
  func.func @sage_fused_kernel(%arg0: i32, %arg1: memref<256x256xbf16, #tpu.memory_space<vmem>>, %arg2: memref<256x128xbf16, #tpu.memory_space<vmem>>, %arg3: memref<128x128xf32, #tpu.memory_space<vmem>>, %arg4: memref<128x128xf32, #tpu.memory_space<vmem>>, %arg5: memref<1x128xf32, #tpu.memory_space<vmem>>, %arg6: memref<128x128xf32, #tpu.memory_space<vmem>>, %arg7: memref<128x128xf32, #tpu.memory_space<vmem>>, %arg8: memref<1x128xf32, #tpu.memory_space<vmem>>, %arg9: memref<256x128xf32, #tpu.memory_space<vmem>>, %arg10: memref<256x128xf32, #tpu.memory_space<vmem>>) attributes {dimension_semantics = [#tpu.dimension_semantics<parallel>], iteration_bounds = array<i64: 1>, scalar_prefetch = 0 : i64, scratch_operands = 0 : i64, tpu.core_type = #tpu.core_type<tc>, window_params = [{transform_indices = @transform_0, window_bounds = array<i64: 256, 256>}, {pipeline_mode = #tpu.pipeline_mode<synchronous>, transform_indices = @transform_1, window_bounds = array<i64: 256, 128>}, {pipeline_mode = #tpu.pipeline_mode<synchronous>, transform_indices = @transform_2, window_bounds = array<i64: 128, 128>}, {pipeline_mode = #tpu.pipeline_mode<synchronous>, transform_indices = @transform_3, window_bounds = array<i64: 128, 128>}, {pipeline_mode = #tpu.pipeline_mode<synchronous>, transform_indices = @transform_4, window_bounds = array<i64: 1, 128>}, {pipeline_mode = #tpu.pipeline_mode<synchronous>, transform_indices = @transform_5, window_bounds = array<i64: 128, 128>}, {pipeline_mode = #tpu.pipeline_mode<synchronous>, transform_indices = @transform_6, window_bounds = array<i64: 128, 128>}, {pipeline_mode = #tpu.pipeline_mode<synchronous>, transform_indices = @transform_7, window_bounds = array<i64: 1, 128>}, {transform_indices = @transform_8, window_bounds = array<i64: 256, 128>}, {transform_indices = @transform_9, window_bounds = array<i64: 256, 128>}]} {
    %c256_i32 = arith.constant 256 : i32
    %0 = arith.muli %arg0, %c256_i32 : i32
    %1 = tpu.assume_multiple %0, 256 : i32
    %c0 = arith.constant 0 : index
    %c0_0 = arith.constant 0 : index
    %2 = vector.load %arg1[%c0, %c0_0] : memref<256x256xbf16, #tpu.memory_space<vmem>>, vector<256x256xbf16>
    %c0_1 = arith.constant 0 : index
    %c0_2 = arith.constant 0 : index
    %3 = vector.load %arg2[%c0_1, %c0_2] : memref<256x128xbf16, #tpu.memory_space<vmem>>, vector<256x128xbf16>
    %4 = arith.index_cast %1 : i32 to index
    %c0_3 = arith.constant 0 : index
    %5 = vector.load %arg2[%4, %c0_3] : memref<256x128xbf16, #tpu.memory_space<vmem>>, vector<256x128xbf16>
    %cst = arith.constant dense<0.000000e+00> : vector<256x128xf32>
    %6 = tpu.matmul %2, %3, %cst {dimension_numbers = #tpu.dot_dimension_numbers<[1], [0], [0], [1], [0, 0, 1, 1], [], []>} : vector<256x256xbf16>, vector<256x128xbf16>, vector<256x128xf32> -> vector<256x128xf32>
    %c0_4 = arith.constant 0 : index
    %c0_5 = arith.constant 0 : index
    %7 = vector.load %arg3[%c0_4, %c0_5] : memref<128x128xf32, #tpu.memory_space<vmem>>, vector<128x128xf32>
    %cst_6 = arith.constant dense<0.000000e+00> : vector<256x128xf32>
    %8 = tpu.matmul %6, %7, %cst_6 {dimension_numbers = #tpu.dot_dimension_numbers<[1], [0], [0], [1], [0, 0, 1, 1], [], []>} : vector<256x128xf32>, vector<128x128xf32>, vector<256x128xf32> -> vector<256x128xf32>
    %c0_7 = arith.constant 0 : index
    %c0_8 = arith.constant 0 : index
    %9 = vector.load %arg4[%c0_7, %c0_8] : memref<128x128xf32, #tpu.memory_space<vmem>>, vector<128x128xf32>
    %cst_9 = arith.constant dense<0.000000e+00> : vector<256x128xf32>
    %10 = tpu.matmul %5, %9, %cst_9 {dimension_numbers = #tpu.dot_dimension_numbers<[1], [0], [0], [1], [0, 0, 1, 1], [], []>} : vector<256x128xbf16>, vector<128x128xf32>, vector<256x128xf32> -> vector<256x128xf32>
    %11 = arith.addf %8, %10 : vector<256x128xf32>
    %c0_10 = arith.constant 0 : index
    %c0_11 = arith.constant 0 : index
    %12 = vector.load %arg5[%c0_10, %c0_11] : memref<1x128xf32, #tpu.memory_space<vmem>>, vector<1x128xf32>
    %13 = vector.broadcast %12 : vector<1x128xf32> to vector<256x128xf32>
    %14 = arith.addf %11, %13 : vector<256x128xf32>
    %15 = arith.mulf %14, %14 : vector<256x128xf32>
    %cst_12 = arith.constant dense<0.000000e+00> : vector<256xf32>
    %16 = vector.multi_reduction <add>, %15, %cst_12 [1] : vector<256x128xf32> to vector<256xf32>
    %17 = vector.shape_cast %16 : vector<256xf32> to vector<256x1xf32>
    %cst_13 = arith.constant 1.000000e-24 : f32
    %18 = vector.broadcast %cst_13 : f32 to vector<256x1xf32>
    %19 = arith.maximumf %17, %18 : vector<256x1xf32>
    %20 = math.rsqrt %19 : vector<256x1xf32>
    %21 = vector.broadcast %20 : vector<256x1xf32> to vector<256x128xf32>
    %22 = arith.mulf %14, %21 : vector<256x128xf32>
    %c0_14 = arith.constant 0 : index
    %c0_15 = arith.constant 0 : index
    %23 = vector.load %arg9[%c0_14, %c0_15] : memref<256x128xf32, #tpu.memory_space<vmem>>, vector<256x128xf32>
    tpu.vector_store %arg9[%c0_14, %c0_15], %22 {strides = array<i32>} : memref<256x128xf32, #tpu.memory_space<vmem>>, vector<256x128xf32>,
    %c0_16 = arith.constant 0 : index
    %c0_17 = arith.constant 0 : index
    %24 = vector.load %arg6[%c0_16, %c0_17] : memref<128x128xf32, #tpu.memory_space<vmem>>, vector<128x128xf32>
    %cst_18 = arith.constant dense<0.000000e+00> : vector<256x128xf32>
    %25 = tpu.matmul %6, %24, %cst_18 {dimension_numbers = #tpu.dot_dimension_numbers<[1], [0], [0], [1], [0, 0, 1, 1], [], []>} : vector<256x128xf32>, vector<128x128xf32>, vector<256x128xf32> -> vector<256x128xf32>
    %c0_19 = arith.constant 0 : index
    %c0_20 = arith.constant 0 : index
    %26 = vector.load %arg7[%c0_19, %c0_20] : memref<128x128xf32, #tpu.memory_space<vmem>>, vector<128x128xf32>
    %cst_21 = arith.constant dense<0.000000e+00> : vector<256x128xf32>
    %27 = tpu.matmul %5, %26, %cst_21 {dimension_numbers = #tpu.dot_dimension_numbers<[1], [0], [0], [1], [0, 0, 1, 1], [], []>} : vector<256x128xbf16>, vector<128x128xf32>, vector<256x128xf32> -> vector<256x128xf32>
    %28 = arith.addf %25, %27 : vector<256x128xf32>
    %c0_22 = arith.constant 0 : index
    %c0_23 = arith.constant 0 : index
    %29 = vector.load %arg8[%c0_22, %c0_23] : memref<1x128xf32, #tpu.memory_space<vmem>>, vector<1x128xf32>
    %30 = vector.broadcast %29 : vector<1x128xf32> to vector<256x128xf32>
    %31 = arith.addf %28, %30 : vector<256x128xf32>
    %32 = arith.mulf %31, %31 : vector<256x128xf32>
    %cst_24 = arith.constant dense<0.000000e+00> : vector<256xf32>
    %33 = vector.multi_reduction <add>, %32, %cst_24 [1] : vector<256x128xf32> to vector<256xf32>
    %34 = vector.shape_cast %33 : vector<256xf32> to vector<256x1xf32>
    %cst_25 = arith.constant 1.000000e-24 : f32
    %35 = vector.broadcast %cst_25 : f32 to vector<256x1xf32>
    %36 = arith.maximumf %34, %35 : vector<256x1xf32>
    %37 = math.rsqrt %36 : vector<256x1xf32>
    %38 = vector.broadcast %37 : vector<256x1xf32> to vector<256x128xf32>
    %39 = arith.mulf %31, %38 : vector<256x128xf32>
    %c0_26 = arith.constant 0 : index
    %c0_27 = arith.constant 0 : index
    %40 = vector.load %arg10[%c0_26, %c0_27] : memref<256x128xf32, #tpu.memory_space<vmem>>, vector<256x128xf32>
    tpu.vector_store %arg10[%c0_26, %c0_27], %39 {strides = array<i32>} : memref<256x128xf32, #tpu.memory_space<vmem>>, vector<256x128xf32>,
    return
  }
  func.func @transform_0(%arg0: i32) -> (i32, i32) {
    %c0_i32 = arith.constant 0 : i32
    %c0_i32_0 = arith.constant 0 : i32
    return %arg0, %c0_i32 : i32, i32
  }
  func.func @transform_1(%arg0: i32) -> (i32, i32) {
    %c0_i32 = arith.constant 0 : i32
    %c0_i32_0 = arith.constant 0 : i32
    %c0_i32_1 = arith.constant 0 : i32
    return %c0_i32, %c0_i32_0 : i32, i32
  }
  func.func @transform_2(%arg0: i32) -> (i32, i32) {
    %c0_i32 = arith.constant 0 : i32
    %c0_i32_0 = arith.constant 0 : i32
    %c0_i32_1 = arith.constant 0 : i32
    return %c0_i32, %c0_i32_0 : i32, i32
  }
  func.func @transform_3(%arg0: i32) -> (i32, i32) {
    %c0_i32 = arith.constant 0 : i32
    %c0_i32_0 = arith.constant 0 : i32
    %c0_i32_1 = arith.constant 0 : i32
    return %c0_i32, %c0_i32_0 : i32, i32
  }
  func.func @transform_4(%arg0: i32) -> (i32, i32) {
    %c0_i32 = arith.constant 0 : i32
    %c0_i32_0 = arith.constant 0 : i32
    %c0_i32_1 = arith.constant 0 : i32
    return %c0_i32, %c0_i32_0 : i32, i32
  }
  func.func @transform_5(%arg0: i32) -> (i32, i32) {
    %c0_i32 = arith.constant 0 : i32
    %c0_i32_0 = arith.constant 0 : i32
    %c0_i32_1 = arith.constant 0 : i32
    return %c0_i32, %c0_i32_0 : i32, i32
  }
  func.func @transform_6(%arg0: i32) -> (i32, i32) {
    %c0_i32 = arith.constant 0 : i32
    %c0_i32_0 = arith.constant 0 : i32
    %c0_i32_1 = arith.constant 0 : i32
    return %c0_i32, %c0_i32_0 : i32, i32
  }
  func.func @transform_7(%arg0: i32) -> (i32, i32) {
    %c0_i32 = arith.constant 0 : i32
    %c0_i32_0 = arith.constant 0 : i32
    %c0_i32_1 = arith.constant 0 : i32
    return %c0_i32, %c0_i32_0 : i32, i32
  }
  func.func @transform_8(%arg0: i32) -> (i32, i32) {
    %c0_i32 = arith.constant 0 : i32
    %c0_i32_0 = arith.constant 0 : i32
    return %arg0, %c0_i32 : i32, i32
  }
  func.func @transform_9(%arg0: i32) -> (i32, i32) {
    %c0_i32 = arith.constant 0 : i32
    %c0_i32_0 = arith.constant 0 : i32
    return %arg0, %c0_i32 : i32, i32
  }
}

</mosaic_0001>

<bundles_post_ra>
// kernel: tpu_custom_call.1
= control target key start
LH: loop header
LB: loop body
LE: loop exit
PB: predicated region body
PF: predicated region fallthrough
CT: control target
= control target key end

     0   :  { %15 = vsyncpa [#allocation3], 0  ;;  %s4277_s0 = inlined_call_operand.hbm [shape: bf16[256,256], index: 0, kind: input, shape index: {}]   ;;  %s4278_s1 = inlined_call_operand.hbm [shape: bf16[256,128], index: 1, kind: input, shape index: {}]   ;;  %s4279_s2 = inlined_call_operand.hbm [shape: f32[128,128], index: 2, kind: input, shape index: {}]   ;;  %s4280_s3 = inlined_call_operand.hbm [shape: f32[128,128], index: 3, kind: input, shape index: {}]   ;;  %s4281_s4 = inlined_call_operand.vmem [shape: f32[1,128], index: 4, kind: input, shape index: {}]   ;;  %s4282_s5 = inlined_call_operand.hbm [shape: f32[128,128], index: 5, kind: input, shape index: {}]   ;;  %s4283_s6 = inlined_call_operand.hbm [shape: f32[128,128], index: 6, kind: input, shape index: {}]   ;;  %s4284_s7 = inlined_call_operand.vmem [shape: f32[1,128], index: 7, kind: input, shape index: {}]   ;;  %s4285_s8 = inlined_call_operand.hbm [shape: f32[256,128], index: 8, kind: output, shape index: {0}]   ;;  %s4286_s9 = inlined_call_operand.hbm [shape: f32[256,128], index: 9, kind: output, shape index: {1}]  }
   0x1   :  { %16 = vsyncpa [#allocation6], 0 }
   0x2   :  { %17 = vsyncpa [#allocation9], 0 }
   0x3   :  { %18 = vsyncpa [#allocation12], 0 }
   0x4   :  { %19 = vsyncpa [#allocation4], 0 }
   0x5   :  { %20 = vsyncpa [#allocation15], 0  ;;  %s3356_s30 = smov [#allocation5]   ;;  %s3168_s13 = scalar_lea.hbm %s4278_s1, 2048 }
   0x6   :  { %s38_s10 = sshll.u32 %s3356_s30, 4  ;;  %p3169_p0 = scmp.ne.s32.totalorder %s4278_s1, %s3168_s13  ;;  %s39_s10 = int_to_ptr.vmem [resolvable:$true] %s38_s10 }
   0x7   :  { %p3172_p1 = scmp.lt.u32.totalorder %s3168_s13, %s4278_s1 }
   0x9   :  { %p3174_p2 = pnand %p3172_p1, %p3169_p0 }
   0xb   :  { %3177 = shalt.err (!%p3174_p2)
}
   0xc   :  { %s3178_s18 = scalar_lea.vmem %s39_s10, 2048  ;;  %p3183_p4 = scmp.lt.s32.totalorder %s39_s10, %s39_s10 }
   0xd   :  { %p3179_p3 = scmp.ne.s32.totalorder %s39_s10, %s3178_s18  ;;  %p3184_p5 = scmp.lt.s32.totalorder %s3178_s18, %s3178_s18 }
   0xf   :  { %p3185_p6 = por %p3184_p5, %p3183_p4 }
  0x11   :  { %p3186_p7 = pnand %p3185_p6, %p3179_p3 }
  0x13   :  { %3189 = shalt.err (!%p3186_p7)
}
  0x14   :  { %s3357_s19 = smov 64   ;;  %s3358_s20 = smov 4  }
  0x15   :  { %44 = dma.hbm_to_vmem [thread:$0]  %s4278_s1, 2048, %s39_s10, [#allocation6], %s3357_s19, %s3357_s19, %s3358_s20  }
  0x16   :  { %s3359_s23 = smov [#allocation8]   ;;  %s3360_s25 = smov [#allocation2]  }
  0x17   :  { %s62_s24 = sshll.u32 %s3359_s23, 4  ;;  %s26_s26 = sshll.u32 %s3360_s25, 4  ;;  %s63_s24 = int_to_ptr.vmem [resolvable:$true] %s62_s24  ;;  %s27_s26 = int_to_ptr.vmem [resolvable:$true] %s26_s26 }
  0x18   :  { %s3190_s29 = scalar_lea.hbm %s4280_s3, 2048 }
  0x19   :  { %p3191_p8 = scmp.ne.s32.totalorder %s4280_s3, %s3190_s29  ;;  %p3194_p9 = scmp.lt.u32.totalorder %s3190_s29, %s4280_s3 }
  0x1b   :  { %p3196_p10 = pnand %p3194_p9, %p3191_p8 }
  0x1d   :  { %3199 = shalt.err (!%p3196_p10)
}
  0x1e   :  { %s3200_s1 = scalar_lea.vmem %s63_s24, 2048  ;;  %p3205_p12 = scmp.lt.s32.totalorder %s63_s24, %s63_s24 }
  0x1f   :  { %p3201_p11 = scmp.ne.s32.totalorder %s63_s24, %s3200_s1  ;;  %p3206_p13 = scmp.lt.s32.totalorder %s3200_s1, %s3200_s1 }
  0x21   :  { %p3207_p0 = por %p3206_p13, %p3205_p12 }
  0x23   :  { %p3208_p1 = pnand %p3207_p0, %p3201_p11 }
  0x25   :  { %3211 = shalt.err (!%p3208_p1)
}
  0x26   :  { %s3361_s10 = smov 128   ;;  %s3362_s14 = smov 8  }
  0x27   :  { %68 = dma.hbm_to_vmem [thread:$0]  %s4280_s3, 2048, %s63_s24, [#allocation9], %s3361_s10, %s3361_s10, %s3362_s14  }
  0x28   :  { %s3212_s19 = scalar_lea.hbm %s4277_s0, 4096 }
  0x29   :  { %p3213_p2 = scmp.ne.s32.totalorder %s4277_s0, %s3212_s19  ;;  %p3216_p3 = scmp.lt.u32.totalorder %s3212_s19, %s4277_s0 }
  0x2b   :  { %p3218_p4 = pnand %p3216_p3, %p3213_p2 }
  0x2d   :  { %3221 = shalt.err (!%p3218_p4)
}
  0x2e   :  { %s3222_s25 = scalar_lea.vmem %s27_s26, 4096  ;;  %p3227_p6 = scmp.lt.s32.totalorder %s27_s26, %s27_s26 }
  0x2f   :  { %p3223_p5 = scmp.ne.s32.totalorder %s27_s26, %s3222_s25  ;;  %p3228_p7 = scmp.lt.s32.totalorder %s3222_s25, %s3222_s25 }
  0x31   :  { %p3229_p8 = por %p3228_p7, %p3227_p6 }
  0x33   :  { %p3230_p9 = pnand %p3229_p8, %p3223_p5 }
  0x35   :  { %3233 = shalt.err (!%p3230_p9)
}
  0x36   :  { %32 = dma.hbm_to_vmem [thread:$0]  %s4277_s0, 4096, %s27_s26, [#allocation3], %s3361_s10, %s3361_s10, %s3362_s14  }
  0x37   :  { %s3363_s27 = smov [#allocation7]   ;;  %s3364_s29 = smov [#allocation10]  }
  0x38   :  { %s50_s28 = sshll.u32 %s3363_s27, 4  ;;  %s76_s30 = sshll.u32 %s3364_s29, 4  ;;  %s51_s28 = int_to_ptr.vmem [resolvable:$true] %s50_s28  ;;  %s77_s30 = int_to_ptr.vmem [resolvable:$true] %s76_s30 }
  0x39   :  { %s3234_s13 = scalar_lea.hbm %s4279_s2, 2048 }
  0x3a   :  { %p3235_p10 = scmp.ne.s32.totalorder %s4279_s2, %s3234_s13  ;;  %p3238_p11 = scmp.lt.u32.totalorder %s3234_s13, %s4279_s2 }
  0x3c   :  { %p3240_p12 = pnand %p3238_p11, %p3235_p10 }
  0x3e   :  { %3243 = shalt.err (!%p3240_p12)
}
  0x3f   :  { %s3244_s0 = scalar_lea.vmem %s51_s28, 2048  ;;  %p3249_p0 = scmp.lt.s32.totalorder %s51_s28, %s51_s28 }
  0x40   :  { %p3245_p13 = scmp.ne.s32.totalorder %s51_s28, %s3244_s0  ;;  %p3250_p1 = scmp.lt.s32.totalorder %s3244_s0, %s3244_s0 }
  0x42   :  { %p3251_p2 = por %p3250_p1, %p3249_p0 }
  0x44   :  { %p3252_p3 = pnand %p3251_p2, %p3245_p13 }
  0x46   :  { %3255 = shalt.err (!%p3252_p3)
}
  0x47   :  { %56 = dma.hbm_to_vmem [thread:$0]  %s4279_s2, 2048, %s51_s28, [#allocation6], %s3361_s10, %s3361_s10, %s3362_s14  }
  0x48   :  { %s3256_s21 = scalar_lea.hbm %s4282_s5, 2048 }
  0x49   :  { %p3257_p4 = scmp.ne.s32.totalorder %s4282_s5, %s3256_s21  ;;  %p3260_p5 = scmp.lt.u32.totalorder %s3256_s21, %s4282_s5 }
  0x4b   :  { %p3262_p6 = pnand %p3260_p5, %p3257_p4 }
  0x4d   :  { %3265 = shalt.err (!%p3262_p6)
}
  0x4e   :  { %s3266_s24 = scalar_lea.vmem %s77_s30, 2048  ;;  %p3271_p8 = scmp.lt.s32.totalorder %s77_s30, %s77_s30 }
  0x4f   :  { %p3267_p7 = scmp.ne.s32.totalorder %s77_s30, %s3266_s24  ;;  %p3272_p9 = scmp.lt.s32.totalorder %s3266_s24, %s3266_s24 }
  0x51   :  { %p3273_p10 = por %p3272_p9, %p3271_p8 }
  0x53   :  { %p3274_p11 = pnand %p3273_p10, %p3267_p7 }
  0x55   :  { %3277 = shalt.err (!%p3274_p11)
}
  0x56   :  { %82 = dma.hbm_to_vmem [thread:$0]  %s4282_s5, 2048, %s77_s30, [#allocation9], %s3361_s10, %s3361_s10, %s3362_s14  }
  0x57   :  { %s3365_s28 = smov [#allocation11]   ;;  %s3278_s13 = scalar_lea.hbm %s4283_s6, 2048 }
  0x58   :  { %s88_s29 = sshll.u32 %s3365_s28, 4  ;;  %p3279_p12 = scmp.ne.s32.totalorder %s4283_s6, %s3278_s13  ;;  %s89_s29 = int_to_ptr.vmem [resolvable:$true] %s88_s29 }
  0x59   :  { %p3282_p13 = scmp.lt.u32.totalorder %s3278_s13, %s4283_s6 }
  0x5b   :  { %p3284_p0 = pnand %p3282_p13, %p3279_p12 }
  0x5d   :  { %3287 = shalt.err (!%p3284_p0)
}
  0x5e   :  { %s3288_s0 = scalar_lea.vmem %s89_s29, 2048  ;;  %p3293_p2 = scmp.lt.s32.totalorder %s89_s29, %s89_s29 }
  0x5f   :  { %p3289_p1 = scmp.ne.s32.totalorder %s89_s29, %s3288_s0  ;;  %p3294_p3 = scmp.lt.s32.totalorder %s3288_s0, %s3288_s0 }
  0x61   :  { %p3295_p4 = por %p3294_p3, %p3293_p2 }
  0x63   :  { %p3296_p5 = pnand %p3295_p4, %p3289_p1 }
  0x65   :  { %3299 = shalt.err (!%p3296_p5)
}
  0x66   :  { %94 = dma.hbm_to_vmem [thread:$0]  %s4283_s6, 2048, %s89_s29, [#allocation12], %s3361_s10, %s3361_s10, %s3362_s14  }
  0x67   :  { %3344 = dma.done.wait [#allocation3], 4096  }
  0x68   :  { %3345 = vsyncadd [#allocation3], 4294963200 }
  0x69   :  { %3346 = dma.done.wait [#allocation6], 4096  }
  0x6a   :  { %3347 = vsyncadd [#allocation6], 4294963200 }
  0x6b   :  { %3348 = dma.done.wait [#allocation9], 4096  }
  0x6c   :  { %3349 = vsyncadd [#allocation9], 4294963200 }
  0x6d   :  { %3350 = dma.done.wait [#allocation12], 2048  }
  0x6e   :  { %3351 = vsyncadd [#allocation12], 4294965248  ;;  %v2960_v0 = vld [vmem:[#allocation5 + $0x40] sm:$0xff]   ;;  %v2962_v2 = vld [vmem:[#allocation5 + $0x48] sm:$0xff]  }
  0x6f   :  { %v2961_v1 = vld [vmem:[#allocation5] sm:$0xff]   ;;  %2260 = vmatprep.subr.bf16.mxu0 %v2960_v0  ;;  %v2963_v3 = vld [vmem:[#allocation5 + $0x8] sm:$0xff]   ;;  %v2964_v4 = vld [vmem:[#allocation5 + $0x50] sm:$0xff]  }
  0x70   :  { %2261 = vmatpush3.bf16.msra.mxu0 %v2961_v1  ;;  %v2965_v5 = vld [vmem:[#allocation5 + $0x10] sm:$0xff]   ;;  %v2966_v6 = vld [vmem:[#allocation5 + $0x58] sm:$0xff]   ;;  %v2968_v8 = vld [vmem:[#allocation5 + $0x60] sm:$0xff]  }
  0x71   :  { %2262 = vmatprep.subr.bf16.mxu0 %v2962_v2  ;;  %v2967_v7 = vld [vmem:[#allocation5 + $0x18] sm:$0xff]   ;;  %v2969_v9 = vld [vmem:[#allocation5 + $0x20] sm:$0xff]   ;;  %v2970_v10 = vld [vmem:[#allocation5 + $0x68] sm:$0xff]  }
  0x72   :  { %v2978_v11 = vld [vmem:[#allocation2 + $0x4] ss:$8 sps:$4 sm:$0xff]   ;;  %v2972_v13 = vld [vmem:[#allocation5 + $0x70] sm:$0xff]   ;;  %v2974_v15 = vld [vmem:[#allocation5 + $0x78] sm:$0xff]  }
  0x73   :  { %v2971_v12 = vld [vmem:[#allocation5 + $0x28] sm:$0xff]   ;;  %505 = vmatprep.mubr.bf16.mxu0 %v2978_v11  ;;  %v2973_v14 = vld [vmem:[#allocation5 + $0x30] sm:$0xff]   ;;  %v2975_v16 = vld [vmem:[#allocation5 + $0x38] sm:$0xff]  }
  0x74   :  { %2263 = vmatpush3.bf16.msra.mxu0 %v2963_v3  ;;  %v2976_v17 = vld [vmem:[#allocation2] ss:$8 sps:$4 sm:$0xff]   ;;  %v2979_v18 = vld [vmem:[#allocation2 + $0x14] ss:$8 sps:$4 sm:$0xff]   ;;  %v2981_v21 = vld [vmem:[#allocation2 + $0x10] ss:$8 sps:$4 sm:$0xff]  }
  0x75   :  { %2264 = vmatprep.subr.bf16.mxu0 %v2964_v4  ;;  %v650_v19 = vld [vmem:[#allocation8] sm:$0xff]  ;;  %v651_v20 = vld [vmem:[#allocation8 + $0x8] sm:$0xff]  ;;  %v652_v23 = vld [vmem:[#allocation8 + $0x10] sm:$0xff] }
  0x76   :  { %v2820_v22 = vpack.c.bf16 %v651_v20, %v650_v19  ;;  %v653_v24 = vld [vmem:[#allocation8 + $0x18] sm:$0xff]  ;;  %v2982_v25 = vld [vmem:[#allocation2 + $0x24] ss:$8 sps:$4 sm:$0xff]   ;;  %v656_v30 = vld [vmem:[#allocation8 + $0x30] sm:$0xff] }
  0x77   :  { %v2824_v26 = vpack.c.bf16 %v653_v24, %v652_v23  ;;  %v654_v27 = vld [vmem:[#allocation8 + $0x20] sm:$0xff]  ;;  %v655_v28 = vld [vmem:[#allocation8 + $0x28] sm:$0xff]  ;;  %v657_v31 = vld [vmem:[#allocation8 + $0x38] sm:$0xff] }
  0x78   :  { %2265 = vmatpush3.bf16.msra.mxu0 %v2965_v5  ;;  %2821 = vmatprep.subr.bf16.mxu1 %v2820_v22  ;;  %v2828_v29 = vpack.c.bf16 %v655_v28, %v654_v27  ;;  %v3505_v32 = vld [vmem:[#allocation5] sm:$0xff]   ;;  %v2985_v34 = vld [vmem:[#allocation2 + $0x34] ss:$8 sps:$4 sm:$0xff]   ;;  %v2832_v35 = vpack.c.bf16 %v657_v31, %v656_v30  ;;  %v659_v37 = vld [vmem:[#allocation8 + $0x48] sm:$0xff] }
  0x79   :  { %2266 = vmatprep.subr.bf16.mxu0 %v2966_v6  ;;  %2823 = vmatpush3.bf16.msra.mxu1 %v2820_v22  ;;  %v2984_v33 = vld [vmem:[#allocation2 + $0x20] ss:$8 sps:$4 sm:$0xff]   ;;  %v660_v39 = vld [vmem:[#allocation8 + $0x50] sm:$0xff]  ;;  %v661_v40 = vld [vmem:[#allocation8 + $0x58] sm:$0xff] }
  0x7a   :  { %2825 = vmatprep.subr.bf16.mxu1 %v2824_v26  ;;  %2564 = vmatprep.mubr.bf16.mxu1 %v3505_v32  ;;  %v658_v36 = vld [vmem:[#allocation8 + $0x40] sm:$0xff]  ;;  %v2987_v41 = vld [vmem:[#allocation2 + $0x30] ss:$8 sps:$4 sm:$0xff]   ;;  %v2840_v43 = vpack.c.bf16 %v661_v40, %v660_v39  ;;  %v663_v45 = vld [vmem:[#allocation8 + $0x68] sm:$0xff] }
  0x7b   :  { %v2836_v38 = vpack.c.bf16 %v659_v37, %v658_v36  ;;  %v2988_v42 = vld [vmem:[#allocation2 + $0x44] ss:$8 sps:$4 sm:$0xff]   ;;  %v664_v47 = vld [vmem:[#allocation8 + $0x70] sm:$0xff]  ;;  %v665_v48 = vld [vmem:[#allocation8 + $0x78] sm:$0xff] }
  0x7c   :  { %2267 = vmatpush3.bf16.msra.mxu0 %v2967_v7  ;;  %v662_v44 = vld [vmem:[#allocation8 + $0x60] sm:$0xff]  ;;  %v2991_v50 = vld [vmem:[#allocation2 + $0x54] ss:$8 sps:$4 sm:$0xff]   ;;  %v2848_v51 = vpack.c.bf16 %v665_v48, %v664_v47  ;;  %v635_v53 = vld [vmem:[#allocation7 + $0x8] sm:$0xff] }
  0x7d   :  { %2268 = vmatprep.subr.bf16.mxu0 %v2968_v8  ;;  %2827 = vmatpush3.bf16.msra.mxu1 %v2824_v26  ;;  %v2844_v46 = vpack.c.bf16 %v663_v45, %v662_v44  ;;  %v2990_v49 = vld [vmem:[#allocation2 + $0x40] ss:$8 sps:$4 sm:$0xff]   ;;  %v636_v58 = vld [vmem:[#allocation7 + $0x10] sm:$0xff]  ;;  %v637_v59 = vld [vmem:[#allocation7 + $0x18] sm:$0xff] }
  0x7e   :  { %2829 = vmatprep.subr.bf16.mxu1 %v2828_v29  ;;  %v634_v52 = vld [vmem:[#allocation7] sm:$0xff]  ;;  %v1460_v55 = vld [vmem:[#allocation11 + $0x8] sm:$0xff]  ;;  %v3510_v61 = vld [vmem:[#allocation5 + $0x10] sm:$0xff]   ;;  %v2856_v63 = vpack.c.bf16 %v637_v59, %v636_v58 }
  0x7f   :  { %v1459_v54 = vld [vmem:[#allocation11] sm:$0xff]  ;;  %v2852_v57 = vpack.c.bf16 %v635_v53, %v634_v52  ;;  %v3508_v60 = vld [vmem:[#allocation5 + $0x8] sm:$0xff]   ;;  %v2993_v62 = vld [vmem:[#allocation2 + $0x50] ss:$8 sps:$4 sm:$0xff]  }
  0x80   :  { %2269 = vmatpush3.bf16.msra.mxu0 %v2969_v9  ;;  %v2884_v56 = vpack.c.bf16 %v1460_v55, %v1459_v54  ;;  %v2994_v0 = vld [vmem:[#allocation2 + $0x64] ss:$8 sps:$4 sm:$0xff]   ;;  %v640_v4 = vld [vmem:[#allocation7 + $0x30] sm:$0xff]  ;;  %v641_v5 = vld [vmem:[#allocation7 + $0x38] sm:$0xff] }
  0x81   :  { %2270 = vmatprep.subr.bf16.mxu0 %v2970_v10  ;;  %2831 = vmatpush3.bf16.msra.mxu1 %v2828_v29  ;;  %v638_v1 = vld [vmem:[#allocation7 + $0x20] sm:$0xff]  ;;  %v639_v2 = vld [vmem:[#allocation7 + $0x28] sm:$0xff]  ;;  %v3514_v6 = vld [vmem:[#allocation5 + $0x18] sm:$0xff]   ;;  %v2864_v9 = vpack.c.bf16 %v641_v5, %v640_v4 }
  0x82   :  { %2833 = vmatprep.subr.bf16.mxu1 %v2832_v35  ;;  %v2860_v3 = vpack.c.bf16 %v639_v2, %v638_v1  ;;  %v3516_v7 = vld [vmem:[#allocation5 + $0x20] sm:$0xff]   ;;  %v2997_v10 = vld [vmem:[#allocation2 + $0x74] ss:$8 sps:$4 sm:$0xff]   ;;  %v647_v22 = vld [vmem:[#allocation7 + $0x68] sm:$0xff] }
  0x83   :  { %v2996_v8 = vld [vmem:[#allocation2 + $0x60] ss:$8 sps:$4 sm:$0xff]   ;;  %v3000_v20 = vld [vmem:[#allocation2 + $0x84] ss:$8 sps:$4 sm:$0xff]   ;;  %v3526_v24 = vld [vmem:[#allocation5 + $0x38] sm:$0xff]  }
  0x84   :  { %2271 = vmatpush3.bf16.msra.mxu0 %v2971_v12  ;;  %v642_v11 = vld [vmem:[#allocation7 + $0x40] sm:$0xff]  ;;  %v643_v12 = vld [vmem:[#allocation7 + $0x48] sm:$0xff]  ;;  %v3003_v27 = vld [vmem:[#allocation2 + $0x94] ss:$8 sps:$4 sm:$0xff]  }
  0x85   :  { %2272 = vmatprep.subr.bf16.mxu0 %v2972_v13  ;;  %2835 = vmatpush3.bf16.msra.mxu1 %v2832_v35  ;;  %v2868_v13 = vpack.c.bf16 %v643_v12, %v642_v11  ;;  %v3002_v26 = vld [vmem:[#allocation2 + $0x80] ss:$8 sps:$4 sm:$0xff]   ;;  %v3534_v29 = vld [vmem:[#allocation5 + $0x50] sm:$0xff]   ;;  %v3006_v31 = vld [vmem:[#allocation2 + $0xa4] ss:$8 sps:$4 sm:$0xff]  }
  0x86   :  { %2837 = vmatprep.subr.bf16.mxu1 %v2836_v38  ;;  %v3532_v28 = vld [vmem:[#allocation5 + $0x48] sm:$0xff]   ;;  %v3005_v30 = vld [vmem:[#allocation2 + $0x90] ss:$8 sps:$4 sm:$0xff]   ;;  %v3009_v36 = vld [vmem:[#allocation2 + $0xb4] ss:$8 sps:$4 sm:$0xff]  }
  0x87   :  { %v3008_v35 = vld [vmem:[#allocation2 + $0xa0] ss:$8 sps:$4 sm:$0xff]   ;;  %v649_v39 = vld [vmem:[#allocation7 + $0x78] sm:$0xff]  ;;  %v3546_v40 = vld [vmem:[#allocation5 + $0x70] sm:$0xff]  }
  0x88   :  { %2273 = vmatpush3.bf16.msra.mxu0 %v2973_v14  ;;  %v644_v14 = vld [vmem:[#allocation7 + $0x50] sm:$0xff]  ;;  %v3544_v37 = vld [vmem:[#allocation5 + $0x68] sm:$0xff]   ;;  %v3550_v44 = vld [vmem:[#allocation5 + $0x78] sm:$0xff]  }
  0x89   :  { %2274 = vmatprep.subr.bf16.mxu0 %v2974_v15  ;;  %2839 = vmatpush3.bf16.msra.mxu1 %v2836_v38  ;;  %v645_v15 = vld [vmem:[#allocation7 + $0x58] sm:$0xff]  ;;  %v648_v38 = vld [vmem:[#allocation7 + $0x70] sm:$0xff]  ;;  %v3014_v45 = vld [vmem:[#allocation2 + $0xc0] ss:$8 sps:$4 sm:$0xff]  }
  0x8a   :  { %2841 = vmatprep.subr.bf16.mxu1 %v2840_v43  ;;  %v2872_v19 = vpack.c.bf16 %v645_v15, %v644_v14  ;;  %v1461_v47 = vld [vmem:[#allocation11 + $0x10] sm:$0xff]  ;;  %v1462_v48 = vld [vmem:[#allocation11 + $0x18] sm:$0xff]  ;;  %v3020_v52 = vld [vmem:[#allocation2 + $0xe0] ss:$8 sps:$4 sm:$0xff]  }
  0x8b   :  { %v3021_v53 = vld [vmem:[#allocation2 + $0xf4] ss:$8 sps:$4 sm:$0xff]   ;;  %v1463_v54 = vld [vmem:[#allocation11 + $0x20] sm:$0xff]  ;;  %v1464_v55 = vld [vmem:[#allocation11 + $0x28] sm:$0xff] }
  0x8c   :  { %2275 = vmatpush3.bf16.msra.mxu0 %v2975_v16  ;;  %v3520_v16 = vld [vmem:[#allocation5 + $0x28] sm:$0xff]   ;;  %v1465_v58 = vld [vmem:[#allocation11 + $0x30] sm:$0xff]  ;;  %v1466_v59 = vld [vmem:[#allocation11 + $0x38] sm:$0xff] }
  0x8d   :  { %2843 = vmatpush3.bf16.msra.mxu1 %v2840_v43  ;;  %2885 = vmatprep.subr.bf16.mxu0 %v2884_v56  ;;  %v3012_v43 = vld [vmem:[#allocation2 + $0xc4] ss:$8 sps:$4 sm:$0xff]   ;;  %v1469_v5 = vld [vmem:[#allocation11 + $0x50] sm:$0xff] }
  0x8e   :  { %2845 = vmatprep.subr.bf16.mxu1 %v2844_v46  ;;  %v1443_v2 = vld [vmem:[#allocation10] sm:$0xff]  ;;  %v1473_v12 = vld [vmem:[#allocation11 + $0x70] sm:$0xff] }
  0x8f   :  { %506 = vmatmul.mubr.bf16.vlgmr.msra.gmra.mrb[0].mxu0 %v2976_v17  ;;  %v3522_v17 = vld [vmem:[#allocation5 + $0x30] sm:$0xff]  }
  0x90   :  { %513 = vmatprep.mubr.bf16.mxu0 %v2979_v18  ;;  %2887 = vmatpush3.bf16.msra.mxu0 %v2884_v56  ;;  %v2999_v18 = vld [vmem:[#allocation2 + $0x70] ss:$8 sps:$4 sm:$0xff]   ;;  %v2892_v56 = vpack.c.bf16 %v1464_v55, %v1463_v54 }
  0x91   :  { %2847 = vmatpush3.bf16.msra.mxu1 %v2844_v46  ;;  %v3015_v46 = vld [vmem:[#allocation2 + $0xd4] ss:$8 sps:$4 sm:$0xff]  }
  0x92   :  { %2849 = vmatprep.subr.bf16.mxu1 %v2848_v51 }
  0x95   :  { %2851 = vmatpush3.bf16.msra.mxu1 %v2848_v51  ;;  %v3018_v51 = vld [vmem:[#allocation2 + $0xe4] ss:$8 sps:$4 sm:$0xff]  }
  0x96   :  { %2853 = vmatprep.subr.bf16.mxu1 %v2852_v57 }
  0x97   :  { %514 = vmatmul.mubr.bf16.gmra.mrb[4].mxu0 %v2981_v21  ;;  %v646_v21 = vld [vmem:[#allocation7 + $0x60] sm:$0xff] }
  0x98   :  { %521 = vmatprep.mubr.bf16.mxu0 %v2982_v25  ;;  %2565 = vmatmul.mubr.bf16.vlgmr.msra.gmra.mrb[0].mxu1 %v3508_v60  ;;  %v2876_v23 = vpack.c.bf16 %v647_v22, %v646_v21  ;;  %v3528_v25 = vld [vmem:[#allocation5 + $0x40] sm:$0xff]  }
  0x99   :  { %2568 = vmatprep.mubr.bf16.mxu1 %v3510_v61  ;;  %2855 = vmatpush3.bf16.msra.mxu1 %v2852_v57  ;;  %v3023_v57 = vld [vmem:[#allocation2 + $0xf0] ss:$8 sps:$4 sm:$0xff]  }
  0x9a   :  { %2857 = vmatprep.subr.bf16.mxu1 %v2856_v63 }
  0x9d   :  { %2859 = vmatpush3.bf16.msra.mxu1 %v2856_v63  ;;  %v1467_v63 = vld [vmem:[#allocation11 + $0x40] sm:$0xff] }
  0x9e   :  { %2861 = vmatprep.subr.bf16.mxu1 %v2860_v3 }
  0x9f   :  { %522 = vmatmul.mubr.bf16.gmra.mrb[8].mxu0 %v2984_v33  ;;  %v3538_v33 = vld [vmem:[#allocation5 + $0x58] sm:$0xff]  }
  0xa0   :  { %529 = vmatprep.mubr.bf16.mxu0 %v2985_v34  ;;  %2569 = vmatmul.mubr.bf16.gmra.mrb[4].mxu1 %v3514_v6  ;;  %v3540_v34 = vld [vmem:[#allocation5 + $0x60] sm:$0xff]  }
  0xa1   :  { %2572 = vmatprep.mubr.bf16.mxu1 %v3516_v7  ;;  %2863 = vmatpush3.bf16.msra.mxu1 %v2860_v3  ;;  %v1444_v3 = vld [vmem:[#allocation10 + $0x8] sm:$0xff] }
  0xa2   :  { %2865 = vmatprep.subr.bf16.mxu1 %v2864_v9  ;;  %v2916_v4 = vpack.c.bf16 %v1444_v3, %v1443_v2 }
  0xa5   :  { %2867 = vmatpush3.bf16.msra.mxu1 %v2864_v9 }
  0xa6   :  { %2869 = vmatprep.subr.bf16.mxu1 %v2868_v13 }
  0xa7   :  { %530 = vmatmul.mubr.bf16.gmra.mrb[12].mxu0 %v2987_v41  ;;  %v2880_v41 = vpack.c.bf16 %v649_v39, %v648_v38 }
  0xa8   :  { %537 = vmatprep.mubr.bf16.mxu0 %v2988_v42  ;;  %2573 = vmatmul.mubr.bf16.gmra.mrb[8].mxu1 %v3520_v16  ;;  %v3011_v42 = vld [vmem:[#allocation2 + $0xb0] ss:$8 sps:$4 sm:$0xff]  }
  0xa9   :  { %2576 = vmatprep.mubr.bf16.mxu1 %v3522_v17  ;;  %2871 = vmatpush3.bf16.msra.mxu1 %v2868_v13  ;;  %v1474_v13 = vld [vmem:[#allocation11 + $0x78] sm:$0xff] }
  0xaa   :  { %2873 = vmatprep.subr.bf16.mxu1 %v2872_v19  ;;  %v2912_v14 = vpack.c.bf16 %v1474_v13, %v1473_v12 }
  0xad   :  { %2875 = vmatpush3.bf16.msra.mxu1 %v2872_v19  ;;  %v1445_v19 = vld [vmem:[#allocation10 + $0x10] sm:$0xff] }
  0xae   :  { %2877 = vmatprep.subr.bf16.mxu1 %v2876_v23 }
  0xaf   :  { %538 = vmatmul.mubr.bf16.gmra.mrb[16].mxu0 %v2990_v49  ;;  %v2888_v49 = vpack.c.bf16 %v1462_v48, %v1461_v47  ;;  %v1453_v47 = vld [vmem:[#allocation10 + $0x50] sm:$0xff]  ;;  %v1454_v48 = vld [vmem:[#allocation10 + $0x58] sm:$0xff] }
  0xb0   :  { %545 = vmatprep.mubr.bf16.mxu0 %v2991_v50  ;;  %2577 = vmatmul.mubr.bf16.gmra.mrb[12].mxu1 %v3526_v24  ;;  %v3017_v50 = vld [vmem:[#allocation2 + $0xd0] ss:$8 sps:$4 sm:$0xff]  }
  0xb1   :  { %2580 = vmatprep.mubr.bf16.mxu1 %v3528_v25  ;;  %2879 = vmatpush3.bf16.msra.mxu1 %v2876_v23 }
  0xb2   :  { %2881 = vmatprep.subr.bf16.mxu1 %v2880_v41  ;;  %2889 = vmatprep.subr.bf16.mxu0 %v2888_v49 }
  0xb3   :  { %2891 = vmatpush3.bf16.msra.mxu0 %v2888_v49 }
  0xb4   :  { %2893 = vmatprep.subr.bf16.mxu0 %v2892_v56 }
  0xb5   :  { %2883 = vmatpush3.bf16.msra.mxu1 %v2880_v41 }
  0xb6   :  { %2917 = vmatprep.subr.bf16.mxu1 %v2916_v4 }
  0xb7   :  { %546 = vmatmul.mubr.bf16.gmra.mrb[20].mxu0 %v2993_v62  ;;  %v2896_v62 = vpack.c.bf16 %v1466_v59, %v1465_v58  ;;  %v1458_v58 = vld [vmem:[#allocation10 + $0x78] sm:$0xff] }
  0xb8   :  { %553 = vmatprep.mubr.bf16.mxu0 %v2994_v0  ;;  %2581 = vmatmul.mubr.bf16.gmra.mrb[16].mxu1 %v3532_v28  ;;  %v1468_v0 = vld [vmem:[#allocation11 + $0x48] sm:$0xff] }
  0xb9   :  { %2584 = vmatprep.mubr.bf16.mxu1 %v3534_v29  ;;  %2895 = vmatpush3.bf16.msra.mxu0 %v2892_v56  ;;  %v2900_v1 = vpack.c.bf16 %v1468_v0, %v1467_v63 }
  0xba   :  { %2897 = vmatprep.subr.bf16.mxu0 %v2896_v62 }
  0xbd   :  { %2899 = vmatpush3.bf16.msra.mxu0 %v2896_v62 }
  0xbe   :  { %2901 = vmatprep.subr.bf16.mxu0 %v2900_v1 }
  0xbf   :  { %554 = vmatmul.mubr.bf16.gmra.mrb[24].mxu0 %v2996_v8  ;;  %v1470_v8 = vld [vmem:[#allocation11 + $0x58] sm:$0xff] }
  0xc0   :  { %561 = vmatprep.mubr.bf16.mxu0 %v2997_v10  ;;  %2585 = vmatmul.mubr.bf16.gmra.mrb[20].mxu1 %v3538_v33  ;;  %v2904_v9 = vpack.c.bf16 %v1470_v8, %v1469_v5  ;;  %v1472_v10 = vld [vmem:[#allocation11 + $0x68] sm:$0xff] }
  0xc1   :  { %2588 = vmatprep.mubr.bf16.mxu1 %v3540_v34  ;;  %2903 = vmatpush3.bf16.msra.mxu0 %v2900_v1 }
  0xc2   :  { %2905 = vmatprep.subr.bf16.mxu0 %v2904_v9 }
  0xc5   :  { %2907 = vmatpush3.bf16.msra.mxu0 %v2904_v9 }
  0xc7   :  { %562 = vmatmul.mubr.bf16.gmra.mrb[28].mxu0 %v2999_v18 }
  0xc8   :  { %569 = vmatprep.mubr.bf16.mxu0 %v3000_v20  ;;  %2589 = vmatmul.mubr.bf16.gmra.mrb[24].mxu1 %v3544_v37  ;;  %v1446_v20 = vld [vmem:[#allocation10 + $0x18] sm:$0xff] }
  0xc9   :  { %2592 = vmatprep.mubr.bf16.mxu1 %v3546_v40 }
  0xcf   :  { %570 = vmatmul.mubr.bf16.gmra.mrb[32].mxu0 %v3002_v26 }
  0xd0   :  { %577 = vmatprep.mubr.bf16.mxu0 %v3003_v27  ;;  %2593 = vmatmul.mubr.bf16.gmra.mrb[28].mxu1 %v3550_v44  ;;  %v2920_v27 = vpack.c.bf16 %v1446_v20, %v1445_v19 }
  0xd7   :  { %578 = vmatmul.mubr.bf16.gmra.mrb[36].mxu0 %v3005_v30  ;;  %v1448_v30 = vld [vmem:[#allocation10 + $0x28] sm:$0xff] }
  0xd8   :  { %585 = vmatprep.mubr.bf16.mxu0 %v3006_v31  ;;  %v1449_v31 = vld [vmem:[#allocation10 + $0x30] sm:$0xff] }
  0xdf   :  { %586 = vmatmul.mubr.bf16.gmra.mrb[40].mxu0 %v3008_v35  ;;  %v1450_v35 = vld [vmem:[#allocation10 + $0x38] sm:$0xff] }
  0xe0   :  { %593 = vmatprep.mubr.bf16.mxu0 %v3009_v36 }
  0xe7   :  { %594 = vmatmul.mubr.bf16.gmra.mrb[44].mxu0 %v3011_v42  ;;  %v1451_v42 = vld [vmem:[#allocation10 + $0x40] sm:$0xff] }
  0xe8   :  { %601 = vmatprep.mubr.bf16.mxu0 %v3012_v43 }
  0xef   :  { %602 = vmatmul.mubr.bf16.gmra.mrb[48].mxu0 %v3014_v45 }
  0xf0   :  { %609 = vmatprep.mubr.bf16.mxu0 %v3015_v46 }
  0xf7   :  { %610 = vmatmul.mubr.bf16.gmra.mrb[52].mxu0 %v3017_v50 }
  0xf8   :  { %617 = vmatprep.mubr.bf16.mxu0 %v3018_v51 }
  0xff   :  { %618 = vmatmul.mubr.bf16.gmra.mrb[56].mxu0 %v3020_v52 }
 0x100   :  { %625 = vmatprep.mubr.bf16.mxu0 %v3021_v53  ;;  %v1455_v53 = vld [vmem:[#allocation10 + $0x60] sm:$0xff] }
 0x107   :  { %626 = vmatmul.mubr.bf16.gmra.mrb[60].mxu0 %v3023_v57  ;;  %v1457_v57 = vld [vmem:[#allocation10 + $0x70] sm:$0xff] }
 0x108   :  { %2708 = vmatprep.mubr.bf16.mxu0 %v3505_v32  ;;  %v1471_v32 = vld [vmem:[#allocation11 + $0x60] sm:$0xff] }
 0x109   :  { %v2908_v11 = vpack.c.bf16 %v1472_v10, %v1471_v32 }
 0x10b   :  { %2909 = vmatprep.subr.bf16.mxu0 %v2908_v11 }
 0x10c   :  { %2911 = vmatpush3.bf16.msra.mxu0 %v2908_v11 }
 0x10d   :  { %2913 = vmatprep.subr.bf16.mxu0 %v2912_v14 }
 0x110   :  { %2915 = vmatpush3.bf16.msra.mxu0 %v2912_v14 }
 0x113   :  { %2709 = vmatmul.mubr.bf16.vlgmr.msra.gmra.mrb[64].mxu0 %v3508_v60  ;;  %v1447_v60 = vld [vmem:[#allocation10 + $0x20] sm:$0xff] }
 0x114   :  { %2712 = vmatprep.mubr.bf16.mxu0 %v3510_v61 }
 0x11b   :  { %2713 = vmatmul.mubr.bf16.gmra.mrb[68].mxu0 %v3514_v6  ;;  %v2924_v6 = vpack.c.bf16 %v1448_v30, %v1447_v60 }
 0x11c   :  { %2716 = vmatprep.mubr.bf16.mxu0 %v3516_v7 }
 0x123   :  { %2717 = vmatmul.mubr.bf16.gmra.mrb[72].mxu0 %v3520_v16  ;;  %v2928_v16 = vpack.c.bf16 %v1450_v35, %v1449_v31 }
 0x124   :  { %2720 = vmatprep.mubr.bf16.mxu0 %v3522_v17  ;;  %v1452_v17 = vld [vmem:[#allocation10 + $0x48] sm:$0xff] }
 0x125   :  { %v2932_v45 = vpack.c.bf16 %v1452_v17, %v1451_v42 }
 0x12b   :  { %2721 = vmatmul.mubr.bf16.gmra.mrb[76].mxu0 %v3526_v24  ;;  %v2936_v24 = vpack.c.bf16 %v1454_v48, %v1453_v47 }
 0x12c   :  { %2724 = vmatprep.mubr.bf16.mxu0 %v3528_v25  ;;  %v1456_v25 = vld [vmem:[#allocation10 + $0x68] sm:$0xff] }
 0x12d   :  { %v2940_v55 = vpack.c.bf16 %v1456_v25, %v1455_v53 }
 0x133   :  { %2725 = vmatmul.mubr.bf16.gmra.mrb[80].mxu0 %v3532_v28  ;;  %v2944_v28 = vpack.c.bf16 %v1458_v58, %v1457_v57 }
 0x134   :  { %2728 = vmatprep.mubr.bf16.mxu0 %v3534_v29 }
 0x13b   :  { %2729 = vmatmul.mubr.bf16.gmra.mrb[84].mxu0 %v3538_v33 }
 0x13c   :  { %2732 = vmatprep.mubr.bf16.mxu0 %v3540_v34 }
 0x143   :  { %2733 = vmatmul.mubr.bf16.gmra.mrb[88].mxu0 %v3544_v37 }
 0x144   :  { %2736 = vmatprep.mubr.bf16.mxu0 %v3546_v40 }
 0x14b   :  { %2737 = vmatmul.mubr.bf16.gmra.mrb[92].mxu0 %v3550_v44 }
 0x162   :  { %v2276_v15 = vpop.f32.mrb[0].mxu0 }
 0x163   :  { %v2277_v18 = vpop.f32.mrb[1].mxu0 }
 0x164   :  { %v3558_v21 = vadd.f32 %v2277_v18, %v2276_v15  ;;  %v2279_v22 = vpop.f32.mrb[2].mxu0 }
 0x165   :  { %v2280_v23 = vpop.f32.mrb[3].mxu0 }
 0x166   :  { %v3560_v26 = vadd.f32 %v2280_v23, %v2279_v22  ;;  %2628 = vmatprep.mubr.f32.mxu1 %v3558_v21 }
 0x168   :  { %2629 = vmatmul.mubr.f32.vlgmr.msra.gmra.mrb[32].mxu1 %v3560_v26 }
 0x169   :  { %2919 = vmatpush3.bf16.msra.mxu1 %v2916_v4 }
 0x16a   :  { %v2282_v61 = vpop.f32.mrb[4].mxu0  ;;  %2921 = vmatprep.subr.bf16.mxu1 %v2920_v27 }
 0x16b   :  { %v2283_v7 = vpop.f32.mrb[5].mxu0  ;;  %v3611_v15 = vpop.f32.mrb[0].mxu1 }
 0x16c   :  { %v3566_v36 = vadd.f32 %v2283_v7, %v2282_v61  ;;  %v2285_v38 = vpop.f32.mrb[6].mxu0  ;;  %v3613_v19 = vpop.f32.mrb[1].mxu1 }
 0x16d   :  { %v2286_v39 = vpop.f32.mrb[7].mxu0  ;;  %2923 = vmatpush3.bf16.msra.mxu1 %v2920_v27  ;;  %v3617_v23 = vpop.f32.mrb[2].mxu1 }
 0x16e   :  { %v3568_v41 = vadd.f32 %v2286_v39, %v2285_v38  ;;  %2631 = vmatprep.mubr.f32.mxu1 %v3566_v36  ;;  %2925 = vmatprep.subr.bf16.mxu1 %v2924_v6  ;;  %v3619_v60 = vpop.f32.mrb[3].mxu1 }
 0x170   :  { %2632 = vmatmul.mubr.f32.gmra.mrb[34].mxu1 %v3568_v41 }
 0x171   :  { %2927 = vmatpush3.bf16.msra.mxu1 %v2924_v6 }
 0x172   :  { %v2288_v43 = vpop.f32.mrb[8].mxu0  ;;  %2929 = vmatprep.subr.bf16.mxu1 %v2928_v16 }
 0x173   :  { %v2289_v46 = vpop.f32.mrb[9].mxu0  ;;  %v3624_v61 = vpop.f32.mrb[4].mxu1 }
 0x174   :  { %v3574_v49 = vadd.f32 %v2289_v46, %v2288_v43  ;;  %v2291_v50 = vpop.f32.mrb[10].mxu0  ;;  %v3626_v6 = vpop.f32.mrb[5].mxu1 }
 0x175   :  { %v2292_v51 = vpop.f32.mrb[11].mxu0  ;;  %2931 = vmatpush3.bf16.msra.mxu1 %v2928_v16  ;;  %v3629_v7 = vpop.f32.mrb[6].mxu1 }
 0x176   :  { %v3576_v52 = vadd.f32 %v2292_v51, %v2291_v50  ;;  %2634 = vmatprep.mubr.f32.mxu1 %v3574_v49  ;;  %2933 = vmatprep.subr.bf16.mxu1 %v2932_v45  ;;  %v3631_v31 = vpop.f32.mrb[7].mxu1 }
 0x178   :  { %2635 = vmatmul.mubr.f32.gmra.mrb[36].mxu1 %v3576_v52 }
 0x179   :  { %2935 = vmatpush3.bf16.msra.mxu1 %v2932_v45 }
 0x17a   :  { %v2294_v54 = vpop.f32.mrb[12].mxu0  ;;  %2937 = vmatprep.subr.bf16.mxu1 %v2936_v24 }
 0x17b   :  { %v2295_v56 = vpop.f32.mrb[13].mxu0  ;;  %v3633_v38 = vpop.f32.mrb[8].mxu1 }
 0x17c   :  { %v3582_v59 = vadd.f32 %v2295_v56, %v2294_v54  ;;  %v2297_v62 = vpop.f32.mrb[14].mxu0  ;;  %v3635_v16 = vpop.f32.mrb[9].mxu1 }
 0x17d   :  { %v2298_v63 = vpop.f32.mrb[15].mxu0  ;;  %2939 = vmatpush3.bf16.msra.mxu1 %v2936_v24  ;;  %v3639_v43 = vpop.f32.mrb[10].mxu1 }
 0x17e   :  { %v3584_v0 = vadd.f32 %v2298_v63, %v2297_v62  ;;  %2637 = vmatprep.mubr.f32.mxu1 %v3582_v59  ;;  %2941 = vmatprep.subr.bf16.mxu1 %v2940_v55  ;;  %v3641_v46 = vpop.f32.mrb[11].mxu1 }
 0x180   :  { %2638 = vmatmul.mubr.f32.gmra.mrb[38].mxu1 %v3584_v0 }
 0x181   :  { %2943 = vmatpush3.bf16.msra.mxu1 %v2940_v55 }
 0x182   :  { %v2300_v29 = vpop.f32.mrb[16].mxu0  ;;  %2945 = vmatprep.subr.bf16.mxu1 %v2944_v28 }
 0x183   :  { %v2301_v1 = vpop.f32.mrb[17].mxu0  ;;  %v3646_v48 = vpop.f32.mrb[12].mxu1 }
 0x184   :  { %v3590_v2 = vadd.f32 %v2301_v1, %v2300_v29  ;;  %v2303_v3 = vpop.f32.mrb[18].mxu0  ;;  %v3648_v50 = vpop.f32.mrb[13].mxu1 }
 0x185   :  { %v2304_v4 = vpop.f32.mrb[19].mxu0  ;;  %2947 = vmatpush3.bf16.msra.mxu1 %v2944_v28  ;;  %v3651_v51 = vpop.f32.mrb[14].mxu1 }
 0x186   :  { %v3592_v5 = vadd.f32 %v2304_v4, %v2303_v3  ;;  %2640 = vmatprep.mubr.f32.mxu1 %v3590_v2  ;;  %v3653_v24 = vpop.f32.mrb[15].mxu1 }
 0x188   :  { %2641 = vmatmul.mubr.f32.gmra.mrb[40].mxu1 %v3592_v5 }
 0x18a   :  { %v2306_v33 = vpop.f32.mrb[20].mxu0 }
 0x18b   :  { %v2307_v34 = vpop.f32.mrb[21].mxu0  ;;  %v3655_v25 = vpop.f32.mrb[16].mxu1 }
 0x18c   :  { %v3598_v8 = vadd.f32 %v2307_v34, %v2306_v33  ;;  %v2309_v9 = vpop.f32.mrb[22].mxu0  ;;  %v3657_v55 = vpop.f32.mrb[17].mxu1 }
 0x18d   :  { %v2310_v32 = vpop.f32.mrb[23].mxu0  ;;  %v3661_v58 = vpop.f32.mrb[18].mxu1 }
 0x18e   :  { %v3600_v10 = vadd.f32 %v2310_v32, %v2309_v9  ;;  %2643 = vmatprep.mubr.f32.mxu1 %v3598_v8  ;;  %v3663_v63 = vpop.f32.mrb[19].mxu1 }
 0x190   :  { %2644 = vmatmul.mubr.f32.gmra.mrb[42].mxu1 %v3600_v10 }
 0x192   :  { %v2312_v11 = vpop.f32.mrb[24].mxu0 }
 0x193   :  { %v2313_v37 = vpop.f32.mrb[25].mxu0  ;;  %v3669_v29 = vpop.f32.mrb[20].mxu1 }
 0x194   :  { %v3605_v12 = vadd.f32 %v2313_v37, %v2312_v11  ;;  %v2315_v13 = vpop.f32.mrb[26].mxu0  ;;  %4301 = vst [vmem:[#allocation22_spill] sm:$0xff] %v3669_v29  ;;  %v3671_v1 = vpop.f32.mrb[21].mxu1 }
 0x195   :  { %v2316_v40 = vpop.f32.mrb[27].mxu0  ;;  %4302 = vst [vmem:[#allocation23_spill] sm:$0xff] %v3671_v1  ;;  %v3673_v4 = vpop.f32.mrb[22].mxu1 }
 0x196   :  { %v3607_v14 = vadd.f32 %v2316_v40, %v2315_v13  ;;  %2646 = vmatprep.mubr.f32.mxu1 %v3605_v12  ;;  %4303 = vst [vmem:[#allocation24_spill] sm:$0xff] %v3673_v4  ;;  %v3675_v34 = vpop.f32.mrb[23].mxu1 }
 0x197   :  { %4304 = vst [vmem:[#allocation25_spill] sm:$0xff] %v3675_v34 }
 0x198   :  { %2647 = vmatmul.mubr.f32.gmra.mrb[44].mxu1 %v3607_v14 }
 0x19a   :  { %v2318_v18 = vpop.f32.mrb[28].mxu0 }
 0x19b   :  { %v2319_v44 = vpop.f32.mrb[29].mxu0  ;;  %v3683_v13 = vpop.f32.mrb[24].mxu1 }
 0x19c   :  { %v3615_v20 = vadd.f32 %v2319_v44, %v2318_v18  ;;  %v2321_v22 = vpop.f32.mrb[30].mxu0  ;;  %4305 = vst [vmem:[#allocation26_spill] sm:$0xff] %v3683_v13  ;;  %v3685_v40 = vpop.f32.mrb[25].mxu1 }
 0x19d   :  { %v2322_v27 = vpop.f32.mrb[31].mxu0  ;;  %4306 = vst [vmem:[#allocation27_spill] sm:$0xff] %v3685_v40  ;;  %v3687_v44 = vpop.f32.mrb[26].mxu1 }
 0x19e   :  { %v3621_v30 = vadd.f32 %v2322_v27, %v2321_v22  ;;  %2649 = vmatprep.mubr.f32.mxu1 %v3615_v20  ;;  %4307 = vst [vmem:[#allocation28_spill] sm:$0xff] %v3687_v44  ;;  %v3689_v27 = vpop.f32.mrb[27].mxu1 }
 0x19f   :  { %4308 = vst [vmem:[#allocation29_spill] sm:$0xff] %v3689_v27 }
 0x1a0   :  { %2650 = vmatmul.mubr.f32.gmra.mrb[46].mxu1 %v3621_v30 }
 0x1a2   :  { %v2324_v35 = vpop.f32.mrb[32].mxu0 }
 0x1a3   :  { %v2325_v39 = vpop.f32.mrb[33].mxu0 }
 0x1a4   :  { %v3637_v42 = vadd.f32 %v2325_v39, %v2324_v35  ;;  %v2327_v17 = vpop.f32.mrb[34].mxu0 }
 0x1a5   :  { %v2328_v45 = vpop.f32.mrb[35].mxu0 }
 0x1a6   :  { %v3643_v47 = vadd.f32 %v2328_v45, %v2327_v17  ;;  %2652 = vmatprep.mubr.f32.mxu1 %v3637_v42 }
 0x1a8   :  { %2653 = vmatmul.mubr.f32.gmra.mrb[48].mxu1 %v3643_v47 }
 0x1aa   :  { %v2330_v53 = vpop.f32.mrb[36].mxu0 }
 0x1ab   :  { %v2331_v54 = vpop.f32.mrb[37].mxu0 }
 0x1ac   :  { %v3659_v56 = vadd.f32 %v2331_v54, %v2330_v53  ;;  %v2333_v57 = vpop.f32.mrb[38].mxu0  ;;  %v3694_v53 = vpop.f32.mrb[28].mxu1 }
 0x1ad   :  { %v2334_v62 = vpop.f32.mrb[39].mxu0  ;;  %4309 = vst [vmem:[#allocation30_spill] sm:$0xff] %v3694_v53  ;;  %v3696_v54 = vpop.f32.mrb[29].mxu1 }
 0x1ae   :  { %v3665_v28 = vadd.f32 %v2334_v62, %v2333_v57  ;;  %2655 = vmatprep.mubr.f32.mxu1 %v3659_v56  ;;  %4310 = vst [vmem:[#allocation31_spill] sm:$0xff] %v3696_v54  ;;  %v3698_v62 = vpop.f32.mrb[30].mxu1 }
 0x1af   :  { %4311 = vst [vmem:[#allocation32_spill] sm:$0xff] %v3698_v62 }
 0x1b0   :  { %2656 = vmatmul.mubr.f32.gmra.mrb[50].mxu1 %v3665_v28 }
 0x1b2   :  { %v2336_v3 = vpop.f32.mrb[40].mxu0 }
 0x1b3   :  { %v2337_v33 = vpop.f32.mrb[41].mxu0 }
 0x1b4   :  { %v3677_v9 = vadd.f32 %v2337_v33, %v2336_v3  ;;  %v2339_v32 = vpop.f32.mrb[42].mxu0  ;;  %v3700_v33 = vpop.f32.mrb[31].mxu1 }
 0x1b5   :  { %v2340_v11 = vpop.f32.mrb[43].mxu0  ;;  %4312 = vst [vmem:[#allocation33_spill] sm:$0xff] %v3700_v33 }
 0x1b6   :  { %v3679_v37 = vadd.f32 %v2340_v11, %v2339_v32  ;;  %2658 = vmatprep.mubr.f32.mxu1 %v3677_v9 }
 0x1b8   :  { %2659 = vmatmul.mubr.f32.gmra.mrb[52].mxu1 %v3679_v37 }
 0x1ba   :  { %v2342_v18 = vpop.f32.mrb[44].mxu0 }
 0x1bb   :  { %v2343_v22 = vpop.f32.mrb[45].mxu0 }
 0x1bc   :  { %v3691_v35 = vadd.f32 %v2343_v22, %v2342_v18  ;;  %v2345_v39 = vpop.f32.mrb[46].mxu0 }
 0x1bd   :  { %v2346_v17 = vpop.f32.mrb[47].mxu0 }
 0x1be   :  { %v2347_v45 = vadd.f32 %v2346_v17, %v2345_v39  ;;  %2661 = vmatprep.mubr.f32.mxu1 %v3691_v35 }
 0x1c0   :  { %2662 = vmatmul.mubr.f32.gmra.mrb[54].mxu1 %v2347_v45 }
 0x1c2   :  { %v2348_v57 = vpop.f32.mrb[48].mxu0 }
 0x1c3   :  { %v2349_v3 = vpop.f32.mrb[49].mxu0 }
 0x1c4   :  { %v2350_v32 = vadd.f32 %v2349_v3, %v2348_v57  ;;  %v2351_v11 = vpop.f32.mrb[50].mxu0 }
 0x1c5   :  { %v2352_v18 = vpop.f32.mrb[51].mxu0 }
 0x1c6   :  { %v2353_v22 = vadd.f32 %v2352_v18, %v2351_v11  ;;  %2664 = vmatprep.mubr.f32.mxu1 %v2350_v32 }
 0x1c8   :  { %2665 = vmatmul.mubr.f32.gmra.mrb[56].mxu1 %v2353_v22 }
 0x1ca   :  { %v2354_v39 = vpop.f32.mrb[52].mxu0 }
 0x1cb   :  { %v2355_v17 = vpop.f32.mrb[53].mxu0 }
 0x1cc   :  { %v2356_v13 = vadd.f32 %v2355_v17, %v2354_v39  ;;  %v2357_v44 = vpop.f32.mrb[54].mxu0 }
 0x1cd   :  { %v2358_v40 = vpop.f32.mrb[55].mxu0 }
 0x1ce   :  { %v2359_v53 = vadd.f32 %v2358_v40, %v2357_v44  ;;  %2667 = vmatprep.mubr.f32.mxu1 %v2356_v13 }
 0x1d0   :  { %2668 = vmatmul.mubr.f32.gmra.mrb[58].mxu1 %v2359_v53 }
 0x1d2   :  { %v2360_v54 = vpop.f32.mrb[56].mxu0 }
 0x1d3   :  { %v2361_v27 = vpop.f32.mrb[57].mxu0 }
 0x1d4   :  { %v2362_v62 = vadd.f32 %v2361_v27, %v2360_v54  ;;  %v2363_v29 = vpop.f32.mrb[58].mxu0 }
 0x1d5   :  { %v2364_v4 = vpop.f32.mrb[59].mxu0 }
 0x1d6   :  { %v2365_v33 = vadd.f32 %v2364_v4, %v2363_v29  ;;  %2670 = vmatprep.mubr.f32.mxu1 %v2362_v62 }
 0x1d8   :  { %2671 = vmatmul.mubr.f32.gmra.mrb[60].mxu1 %v2365_v33 }
 0x1da   :  { %v2366_v57 = vpop.f32.mrb[60].mxu0 }
 0x1db   :  { %v2367_v3 = vpop.f32.mrb[61].mxu0 }
 0x1dc   :  { %v2368_v11 = vadd.f32 %v2367_v3, %v2366_v57  ;;  %v2369_v18 = vpop.f32.mrb[62].mxu0 }
 0x1dd   :  { %v2370_v1 = vpop.f32.mrb[63].mxu0 }
 0x1de   :  { %v2371_v34 = vadd.f32 %v2370_v1, %v2369_v18  ;;  %2673 = vmatprep.mubr.f32.mxu1 %v2368_v11 }
 0x1e0   :  { %2674 = vmatmul.mubr.f32.gmra.mrb[62].mxu1 %v2371_v34 }
 0x1e1   :  { %2772 = vmatprep.mubr.f32.mxu1 %v3558_v21 }
 0x1e4   :  { %2773 = vmatmul.mubr.f32.vlgmr.msra.gmra.mrb[64].mxu1 %v3560_v26 }
 0x1e5   :  { %2775 = vmatprep.mubr.f32.mxu1 %v3566_v36 }
 0x1e6   :  { %v3725_v21 = vpop.f32.mrb[64].mxu0 }
 0x1e7   :  { %v3727_v26 = vpop.f32.mrb[65].mxu0 }
 0x1e8   :  { %2776 = vmatmul.mubr.f32.gmra.mrb[66].mxu1 %v3568_v41  ;;  %v3729_v36 = vpop.f32.mrb[66].mxu0 }
 0x1e9   :  { %2778 = vmatprep.mubr.f32.mxu1 %v3574_v49  ;;  %v3731_v41 = vpop.f32.mrb[67].mxu0 }
 0x1ec   :  { %2779 = vmatmul.mubr.f32.gmra.mrb[68].mxu1 %v3576_v52 }
 0x1ed   :  { %2781 = vmatprep.mubr.f32.mxu1 %v3582_v59  ;;  %v3738_v59 = vld [vmem:[%s4281_s4] ss:$0 sm:$0xff] }
 0x1ee   :  { %v3733_v49 = vpop.f32.mrb[68].mxu0 }
 0x1f0   :  { %2782 = vmatmul.mubr.f32.gmra.mrb[70].mxu1 %v3584_v0  ;;  %v3740_v0 = vpop.f32.mrb[69].mxu0 }
 0x1f1   :  { %2784 = vmatprep.mubr.f32.mxu1 %v3590_v2 }
 0x1f4   :  { %2785 = vmatmul.mubr.f32.gmra.mrb[72].mxu1 %v3592_v5 }
 0x1f5   :  { %2787 = vmatprep.mubr.f32.mxu1 %v3598_v8  ;;  %v3743_v8 = vpop.f32.mrb[70].mxu0 }
 0x1f8   :  { %2788 = vmatmul.mubr.f32.gmra.mrb[74].mxu1 %v3600_v10 }
 0x1f9   :  { %2790 = vmatprep.mubr.f32.mxu1 %v3605_v12  ;;  %v3746_v12 = vpop.f32.mrb[71].mxu0 }
 0x1fc   :  { %2791 = vmatmul.mubr.f32.gmra.mrb[76].mxu1 %v3607_v14 }
 0x1fd   :  { %2793 = vmatprep.mubr.f32.mxu1 %v3615_v20 }
 0x200   :  { %2794 = vmatmul.mubr.f32.gmra.mrb[78].mxu1 %v3621_v30 }
 0x201   :  { %2796 = vmatprep.mubr.f32.mxu1 %v3637_v42  ;;  %v3756_v42 = vpop.f32.mrb[72].mxu0 }
 0x204   :  { %2797 = vmatmul.mubr.f32.gmra.mrb[80].mxu1 %v3643_v47  ;;  %v3758_v47 = vpop.f32.mrb[73].mxu0 }
 0x205   :  { %2799 = vmatprep.mubr.f32.mxu1 %v3659_v56  ;;  %v3763_v29 = vpop.f32.mrb[74].mxu0 }
 0x206   :  { %v3766_v4 = vpop.f32.mrb[75].mxu0 }
 0x208   :  { %2800 = vmatmul.mubr.f32.gmra.mrb[82].mxu1 %v3665_v28 }
 0x209   :  { %2802 = vmatprep.mubr.f32.mxu1 %v3677_v9 }
 0x20c   :  { %2803 = vmatmul.mubr.f32.gmra.mrb[84].mxu1 %v3679_v37  ;;  %v3776_v37 = vpop.f32.mrb[76].mxu0 }
 0x20d   :  { %2805 = vmatprep.mubr.f32.mxu1 %v3691_v35  ;;  %v3778_v40 = vpop.f32.mrb[77].mxu0 }
 0x20e   :  { %v3783_v35 = vpop.f32.mrb[78].mxu0 }
 0x210   :  { %2806 = vmatmul.mubr.f32.gmra.mrb[86].mxu1 %v2347_v45 }
 0x211   :  { %2808 = vmatprep.mubr.f32.mxu1 %v2350_v32 }
 0x214   :  { %2809 = vmatmul.mubr.f32.gmra.mrb[88].mxu1 %v2353_v22 }
 0x215   :  { %2811 = vmatprep.mubr.f32.mxu1 %v2356_v13 }
 0x218   :  { %2812 = vmatmul.mubr.f32.gmra.mrb[90].mxu1 %v2359_v53  ;;  %v3786_v53 = vpop.f32.mrb[79].mxu0 }
 0x219   :  { %2814 = vmatprep.mubr.f32.mxu1 %v2362_v62  ;;  %v3798_v32 = vpop.f32.mrb[80].mxu0 }
 0x21c   :  { %2815 = vmatmul.mubr.f32.gmra.mrb[92].mxu1 %v2365_v33 }
 0x21d   :  { %2817 = vmatprep.mubr.f32.mxu1 %v2368_v11 }
 0x220   :  { %2818 = vmatmul.mubr.f32.gmra.mrb[94].mxu1 %v2371_v34 }
 0x23b   :  { %v2630_v52 = vpop.f32.mrb[32].mxu1 }
 0x23c   :  { %v1027_v2 = vadd.f32 %v2630_v52, %v3619_v60  ;;  %v1021_v5 = vpop.f32.mrb[33].mxu1 }
 0x23d   :  { %v1022_v10 = vadd.f32 %v1021_v5, %v3613_v19 }
 0x23e   :  { %v3749_v14 = vadd.f32 %v3738_v59, %v1027_v2 }
 0x23f   :  { %v3752_v20 = vadd.f32 %v3738_v59, %v1022_v10 }
 0x240   :  { %v1220_v30 = vmul.f32 %v3749_v14, %v3749_v14 }
 0x241   :  { %v1219_v28 = vmul.f32 %v3752_v20, %v3752_v20 }
 0x242   :  { %1253 = vadd.xlane.f32.xlu0 %v1220_v30 }
 0x243   :  { %v2633_v60 = vpop.f32.mrb[34].mxu1 }
 0x244   :  { %v1037_v56 = vadd.f32 %v2633_v60, %v3617_v23  ;;  %v1031_v19 = vpop.f32.mrb[35].mxu1 }
 0x245   :  { %v1032_v1 = vadd.f32 %v3611_v15, %v1031_v19 }
 0x246   :  { %1251 = vadd.xlane.f32.xlu0 %v1219_v28  ;;  %v3769_v34 = vadd.f32 %v3738_v59, %v1037_v56 }
 0x247   :  { %v3772_v9 = vadd.f32 %v3738_v59, %v1032_v1 }
 0x248   :  { %v1222_v23 = vmul.f32 %v3769_v34, %v3769_v34 }
 0x249   :  { %v1221_v27 = vmul.f32 %v3772_v9, %v3772_v9 }
 0x24a   :  { %1257 = vadd.xlane.f32.xlu1 %v1222_v23 }
 0x24b   :  { %v2636_v13 = vpop.f32.mrb[36].mxu1 }
 0x24c   :  { %v1047_v15 = vadd.f32 %v2636_v13, %v3631_v31  ;;  %v1041_v44 = vpop.f32.mrb[37].mxu1 }
 0x24d   :  { %v1042_v45 = vadd.f32 %v1041_v44, %v3626_v6  ;;  %v3800_v6 = vpop.f32.mrb[81].mxu0 }
 0x24e   :  { %v3789_v54 = vadd.f32 %v3738_v59, %v1047_v15  ;;  %1255 = vadd.xlane.f32.xlu1 %v1221_v27  ;;  %v3803_v57 = vpop.f32.mrb[82].mxu0 }
 0x24f   :  { %v3792_v62 = vadd.f32 %v3738_v59, %v1042_v45  ;;  %v3806_v11 = vpop.f32.mrb[83].mxu0 }
 0x250   :  { %v1224_v31 = vmul.f32 %v3789_v54, %v3789_v54 }
 0x251   :  { %v1223_v33 = vmul.f32 %v3792_v62, %v3792_v62 }
 0x252   :  { %1261 = vadd.xlane.f32.xlu1 %v1224_v31 }
 0x253   :  { %v2639_v22 = vpop.f32.mrb[38].mxu1  ;;  %1259 = vadd.xlane.f32.xlu0 %v1223_v33 }
 0x254   :  { %v1057_v39 = vadd.f32 %v2639_v22, %v3629_v7  ;;  %v1051_v17 = vpop.f32.mrb[39].mxu1  ;;  %v3818_v7 = vpop.f32.mrb[84].mxu0 }
 0x255   :  { %v1052_v3 = vadd.f32 %v3624_v61, %v1051_v17  ;;  %v3820_v61 = vpop.f32.mrb[85].mxu0 }
 0x256   :  { %v3809_v18 = vadd.f32 %v3738_v59, %v1057_v39  ;;  %v3823_v56 = vpop.f32.mrb[86].mxu0 }
 0x257   :  { %v3812_v52 = vadd.f32 %v3738_v59, %v1052_v3  ;;  %v3826_v28 = vpop.f32.mrb[87].mxu0 }
 0x258   :  { %v1226_v2 = vmul.f32 %v3809_v18, %v3809_v18 }
 0x259   :  { %v1225_v5 = vmul.f32 %v3812_v52, %v3812_v52 }
 0x25a   :  { %1265 = vadd.xlane.f32.xlu1 %v1226_v2 }
 0x25b   :  { %v2642_v10 = vpop.f32.mrb[40].mxu1  ;;  %1263 = vadd.xlane.f32.xlu0 %v1225_v5 }
 0x25c   :  { %v1067_v30 = vadd.f32 %v2642_v10, %v3641_v46  ;;  %v1061_v60 = vpop.f32.mrb[41].mxu1  ;;  %v3838_v46 = vpop.f32.mrb[88].mxu0 }
 0x25d   :  { %v1062_v19 = vadd.f32 %v1061_v60, %v3635_v16  ;;  %v3840_v16 = vpop.f32.mrb[89].mxu0 }
 0x25e   :  { %v3829_v1 = vadd.f32 %v3738_v59, %v1067_v30  ;;  %v3843_v31 = vpop.f32.mrb[90].mxu0 }
 0x25f   :  { %v3832_v23 = vadd.f32 %v3738_v59, %v1062_v19  ;;  %v3846_v22 = vpop.f32.mrb[91].mxu0 }
 0x260   :  { %v1228_v13 = vmul.f32 %v3829_v1, %v3829_v1 }
 0x261   :  { %v1227_v15 = vmul.f32 %v3832_v23, %v3832_v23 }
 0x262   :  { %1269 = vadd.xlane.f32.xlu1 %v1228_v13 }
 0x263   :  { %v2645_v44 = vpop.f32.mrb[42].mxu1  ;;  %1267 = vadd.xlane.f32.xlu0 %v1227_v15 }
 0x264   :  { %v1077_v27 = vadd.f32 %v2645_v44, %v3639_v43  ;;  %v1071_v45 = vpop.f32.mrb[43].mxu1  ;;  %v3858_v43 = vpop.f32.mrb[92].mxu0 }
 0x265   :  { %v1072_v33 = vadd.f32 %v3633_v38, %v1071_v45  ;;  %v3860_v38 = vpop.f32.mrb[93].mxu0 }
 0x266   :  { %v3849_v39 = vadd.f32 %v3738_v59, %v1077_v27  ;;  %v3863_v60 = vpop.f32.mrb[94].mxu0 }
 0x267   :  { %v3852_v17 = vadd.f32 %v3738_v59, %v1072_v33  ;;  %v3866_v13 = vpop.f32.mrb[95].mxu0 }
 0x268   :  { %v1230_v3 = vmul.f32 %v3849_v39, %v3849_v39 }
 0x269   :  { %v1229_v2 = vmul.f32 %v3852_v17, %v3852_v17 }
 0x26a   :  { %1273 = vadd.xlane.f32.xlu1 %v1230_v3 }
 0x26b   :  { %v2648_v5 = vpop.f32.mrb[44].mxu1  ;;  %1271 = vadd.xlane.f32.xlu0 %v1229_v2 }
 0x26c   :  { %v1087_v10 = vadd.f32 %v2648_v5, %v3653_v24  ;;  %v1081_v30 = vpop.f32.mrb[45].mxu1 }
 0x26d   :  { %v1082_v19 = vadd.f32 %v1081_v30, %v3648_v50 }
 0x26e   :  { %v3869_v15 = vadd.f32 %v3738_v59, %v1087_v10 }
 0x26f   :  { %v3872_v44 = vadd.f32 %v3738_v59, %v1082_v19 }
 0x270   :  { %v1232_v27 = vmul.f32 %v3869_v15, %v3869_v15 }
 0x271   :  { %v1231_v45 = vmul.f32 %v3872_v44, %v3872_v44 }
 0x272   :  { %1277 = vadd.xlane.f32.xlu1 %v1232_v27 }
 0x273   :  { %v2651_v24 = vpop.f32.mrb[46].mxu1  ;;  %1275 = vadd.xlane.f32.xlu0 %v1231_v45 }
 0x274   :  { %v1097_v33 = vadd.f32 %v2651_v24, %v3651_v51  ;;  %v1091_v50 = vpop.f32.mrb[47].mxu1 }
 0x275   :  { %v1092_v3 = vadd.f32 %v3646_v48, %v1091_v50 }
 0x276   :  { %v3881_v2 = vadd.f32 %v3738_v59, %v1097_v33 }
 0x277   :  { %v3884_v5 = vadd.f32 %v3738_v59, %v1092_v3 }
 0x278   :  { %v1234_v10 = vmul.f32 %v3881_v2, %v3881_v2 }
 0x279   :  { %v1233_v30 = vmul.f32 %v3884_v5, %v3884_v5 }
 0x27a   :  { %1281 = vadd.xlane.f32.xlu1 %v1234_v10 }
 0x27b   :  { %v2654_v19 = vpop.f32.mrb[48].mxu1  ;;  %1279 = vadd.xlane.f32.xlu0 %v1233_v30 }
 0x27c   :  { %v1107_v51 = vadd.f32 %v2654_v19, %v3663_v63  ;;  %v1101_v27 = vpop.f32.mrb[49].mxu1 }
 0x27d   :  { %v1102_v48 = vadd.f32 %v1101_v27, %v3657_v55 }
 0x27e   :  { %v3893_v45 = vadd.f32 %v3738_v59, %v1107_v51 }
 0x27f   :  { %v3896_v24 = vadd.f32 %v3738_v59, %v1102_v48 }
 0x280   :  { %v1236_v33 = vmul.f32 %v3893_v45, %v3893_v45 }
 0x281   :  { %v1235_v50 = vmul.f32 %v3896_v24, %v3896_v24 }
 0x282   :  { %1285 = vadd.xlane.f32.xlu1 %v1236_v33  ;;  %v4315_v33 = vld [vmem:[#allocation25_spill] sm:$0xff] }
 0x283   :  { %v2657_v3 = vpop.f32.mrb[50].mxu1  ;;  %1283 = vadd.xlane.f32.xlu0 %v1235_v50 }
 0x284   :  { %v1117_v63 = vadd.f32 %v2657_v3, %v3661_v58  ;;  %v1111_v10 = vpop.f32.mrb[51].mxu1  ;;  %v4316_v3 = vld [vmem:[#allocation23_spill] sm:$0xff] }
 0x285   :  { %v1112_v55 = vadd.f32 %v3655_v25, %v1111_v10 }
 0x286   :  { %v3905_v30 = vadd.f32 %v3738_v59, %v1117_v63 }
 0x287   :  { %v3908_v19 = vadd.f32 %v3738_v59, %v1112_v55 }
 0x288   :  { %4313 = vst [vmem:[#allocation34_spill] sm:$0xff] %v3905_v30  ;;  %v1238_v51 = vmul.f32 %v3905_v30, %v3905_v30  ;;  %v4320_v30 = vld [vmem:[#allocation22_spill] sm:$0xff] }
 0x289   :  { %4314 = vst [vmem:[#allocation35_spill] sm:$0xff] %v3908_v19  ;;  %v1237_v27 = vmul.f32 %v3908_v19, %v3908_v19 }
 0x28a   :  { %1289 = vadd.xlane.f32.xlu1 %v1238_v51 }
 0x28b   :  { %v2660_v48 = vpop.f32.mrb[52].mxu1  ;;  %1287 = vadd.xlane.f32.xlu0 %v1237_v27  ;;  %v4319_v27 = vld [vmem:[#allocation24_spill] sm:$0xff] }
 0x28c   :  { %v1127_v58 = vadd.f32 %v2660_v48, %v4315_v33  ;;  %v1121_v50 = vpop.f32.mrb[53].mxu1 }
 0x28d   :  { %v1122_v25 = vadd.f32 %v1121_v50, %v4316_v3 }
 0x28e   :  { %v3917_v63 = vadd.f32 %v3738_v59, %v1127_v58 }
 0x28f   :  { %v3920_v10 = vadd.f32 %v3738_v59, %v1122_v25 }
 0x290   :  { %4317 = vst [vmem:[#allocation25_spill] sm:$0xff] %v3917_v63  ;;  %v1240_v55 = vmul.f32 %v3917_v63, %v3917_v63  ;;  %v4324_v63 = vld [vmem:[#allocation27_spill] sm:$0xff] }
 0x291   :  { %4318 = vst [vmem:[#allocation23_spill] sm:$0xff] %v3920_v10  ;;  %v1239_v19 = vmul.f32 %v3920_v10, %v3920_v10 }
 0x292   :  { %1293 = vadd.xlane.f32.xlu1 %v1240_v55 }
 0x293   :  { %v2663_v51 = vpop.f32.mrb[54].mxu1  ;;  %1291 = vadd.xlane.f32.xlu0 %v1239_v19  ;;  %v4323_v19 = vld [vmem:[#allocation29_spill] sm:$0xff] }
 0x294   :  { %v1137_v48 = vadd.f32 %v2663_v51, %v4319_v27  ;;  %v1131_v33 = vpop.f32.mrb[55].mxu1 }
 0x295   :  { %v1132_v50 = vadd.f32 %v4320_v30, %v1131_v33 }
 0x296   :  { %v3929_v58 = vadd.f32 %v3738_v59, %v1137_v48 }
 0x297   :  { %v3932_v3 = vadd.f32 %v3738_v59, %v1132_v50 }
 0x298   :  { %4321 = vst [vmem:[#allocation24_spill] sm:$0xff] %v3929_v58  ;;  %v1242_v25 = vmul.f32 %v3929_v58, %v3929_v58  ;;  %v4328_v58 = vld [vmem:[#allocation26_spill] sm:$0xff] }
 0x299   :  { %4322 = vst [vmem:[#allocation22_spill] sm:$0xff] %v3932_v3  ;;  %v1241_v10 = vmul.f32 %v3932_v3, %v3932_v3 }
 0x29a   :  { %1297 = vadd.xlane.f32.xlu1 %v1242_v25 }
 0x29b   :  { %v2666_v55 = vpop.f32.mrb[56].mxu1  ;;  %1295 = vadd.xlane.f32.xlu0 %v1241_v10  ;;  %v4327_v10 = vld [vmem:[#allocation28_spill] sm:$0xff] }
 0x29c   :  { %v1147_v51 = vadd.f32 %v2666_v55, %v4323_v19  ;;  %v1141_v27 = vpop.f32.mrb[57].mxu1 }
 0x29d   :  { %v1142_v30 = vadd.f32 %v1141_v27, %v4324_v63 }
 0x29e   :  { %v3941_v48 = vadd.f32 %v3738_v59, %v1147_v51 }
 0x29f   :  { %v3944_v33 = vadd.f32 %v3738_v59, %v1142_v30 }
 0x2a0   :  { %4325 = vst [vmem:[#allocation29_spill] sm:$0xff] %v3941_v48  ;;  %v1244_v50 = vmul.f32 %v3941_v48, %v3941_v48  ;;  %v4332_v48 = vld [vmem:[#allocation31_spill] sm:$0xff] }
 0x2a1   :  { %4326 = vst [vmem:[#allocation27_spill] sm:$0xff] %v3944_v33  ;;  %v1243_v3 = vmul.f32 %v3944_v33, %v3944_v33 }
 0x2a2   :  { %1301 = vadd.xlane.f32.xlu1 %v1244_v50 }
 0x2a3   :  { %v2669_v25 = vpop.f32.mrb[58].mxu1  ;;  %1299 = vadd.xlane.f32.xlu0 %v1243_v3  ;;  %v4331_v3 = vld [vmem:[#allocation33_spill] sm:$0xff] }
 0x2a4   :  { %v1157_v55 = vadd.f32 %v2669_v25, %v4327_v10  ;;  %v1151_v19 = vpop.f32.mrb[59].mxu1 }
 0x2a5   :  { %v1152_v63 = vadd.f32 %v4328_v58, %v1151_v19 }
 0x2a6   :  { %v3953_v51 = vadd.f32 %v3738_v59, %v1157_v55 }
 0x2a7   :  { %v3956_v27 = vadd.f32 %v3738_v59, %v1152_v63 }
 0x2a8   :  { %4329 = vst [vmem:[#allocation28_spill] sm:$0xff] %v3953_v51  ;;  %v1246_v30 = vmul.f32 %v3953_v51, %v3953_v51  ;;  %v4335_v51 = vld [vmem:[#allocation30_spill] sm:$0xff] }
 0x2a9   :  { %4330 = vst [vmem:[#allocation26_spill] sm:$0xff] %v3956_v27  ;;  %v1245_v33 = vmul.f32 %v3956_v27, %v3956_v27 }
 0x2aa   :  { %1305 = vadd.xlane.f32.xlu1 %v1246_v30 }
 0x2ab   :  { %v2672_v50 = vpop.f32.mrb[60].mxu1  ;;  %1303 = vadd.xlane.f32.xlu0 %v1245_v33  ;;  %v4334_v33 = vld [vmem:[#allocation32_spill] sm:$0xff] }
 0x2ac   :  { %v1167_v25 = vadd.f32 %v2672_v50, %v4331_v3  ;;  %v1161_v10 = vpop.f32.mrb[61].mxu1 }
 0x2ad   :  { %v1162_v58 = vadd.f32 %v1161_v10, %v4332_v48 }
 0x2ae   :  { %v3965_v55 = vadd.f32 %v3738_v59, %v1167_v25 }
 0x2af   :  { %v3968_v19 = vadd.f32 %v3738_v59, %v1162_v58 }
 0x2b0   :  { %4333 = vst [vmem:[#allocation33_spill] sm:$0xff] %v3965_v55  ;;  %v1248_v63 = vmul.f32 %v3965_v55, %v3965_v55  ;;  %v3985_v55 = vld [vmem:[%s4284_s7] ss:$0 sm:$0xff]  ;;  %s3366_s7 = smov [#allocation13]  }
 0x2b1   :  { %v1247_v27 = vmul.f32 %v3968_v19, %v3968_v19  ;;  %s2161_s19 = sshll.u32 %s3366_s7, 4  ;;  %s2162_s19 = int_to_ptr.vmem [resolvable:$true] %s2161_s19 }
 0x2b2   :  { %1309 = vadd.xlane.f32.xlu1 %v1248_v63  ;;  %s3300_s20 = scalar_lea.vmem %s2162_s19, 4096  ;;  %p3305_p7 = scmp.lt.s32.totalorder %s2162_s19, %s2162_s19 }
 0x2b3   :  { %v2675_v30 = vpop.f32.mrb[62].mxu1  ;;  %1307 = vadd.xlane.f32.xlu0 %v1247_v27  ;;  %p3301_p6 = scmp.ne.s32.totalorder %s2162_s19, %s3300_s20  ;;  %p3306_p8 = scmp.lt.s32.totalorder %s3300_s20, %s3300_s20 }
 0x2b4   :  { %v1177_v50 = vadd.f32 %v2675_v30, %v4334_v33  ;;  %v1171_v3 = vpop.f32.mrb[63].mxu1 }
 0x2b5   :  { %v1172_v48 = vadd.f32 %v4335_v51, %v1171_v3  ;;  %p3307_p9 = por %p3306_p8, %p3305_p7 }
 0x2b6   :  { %v3977_v25 = vadd.f32 %v3738_v59, %v1177_v50 }
 0x2b7   :  { %v3980_v10 = vadd.f32 %v3738_v59, %v1172_v48  ;;  %v2774_v58 = vpop.f32.mrb[64].mxu1  ;;  %p3308_p10 = pnand %p3307_p9, %p3301_p6 }
 0x2b8   :  { %v1740_v63 = vadd.f32 %v2774_v58, %v3731_v41  ;;  %v1734_v27 = vpop.f32.mrb[65].mxu1  ;;  %v1250_v30 = vmul.f32 %v3977_v25, %v3977_v25 }
 0x2b9   :  { %v1735_v51 = vadd.f32 %v1734_v27, %v3727_v26  ;;  %v1249_v33 = vmul.f32 %v3980_v10, %v3980_v10 }
 0x2ba   :  { %v3994_v59 = vadd.f32 %v3985_v55, %v1740_v63  ;;  %1313 = vadd.xlane.f32.xlu1 %v1250_v30 }
 0x2bb   :  { %v3997_v50 = vadd.f32 %v3985_v55, %v1735_v51  ;;  %v2777_v3 = vpop.f32.mrb[66].mxu1  ;;  %1311 = vadd.xlane.f32.xlu0 %v1249_v33 }
 0x2bc   :  { %v1750_v41 = vadd.f32 %v2777_v3, %v3729_v36  ;;  %v1744_v48 = vpop.f32.mrb[67].mxu1  ;;  %v1933_v58 = vmul.f32 %v3994_v59, %v3994_v59 }
 0x2bd   :  { %v1745_v26 = vadd.f32 %v3725_v21, %v1744_v48  ;;  %v1932_v27 = vmul.f32 %v3997_v50, %v3997_v50 }
 0x2be   :  { %v4006_v63 = vadd.f32 %v3985_v55, %v1750_v41  ;;  %1966 = vadd.xlane.f32.xlu1 %v1933_v58 }
 0x2bf   :  { %v4009_v30 = vadd.f32 %v3985_v55, %v1745_v26  ;;  %v2780_v51 = vpop.f32.mrb[68].mxu1  ;;  %1964 = vadd.xlane.f32.xlu0 %v1932_v27 }
 0x2c0   :  { %v1760_v36 = vadd.f32 %v2780_v51, %v3746_v12  ;;  %v1754_v33 = vpop.f32.mrb[69].mxu1  ;;  %v1935_v3 = vmul.f32 %v4006_v63, %v4006_v63 }
 0x2c1   :  { %v1755_v21 = vadd.f32 %v1754_v33, %v3740_v0  ;;  %v1934_v48 = vmul.f32 %v4009_v30, %v4009_v30 }
 0x2c2   :  { %v4018_v41 = vadd.f32 %v3985_v55, %v1760_v36  ;;  %1970 = vadd.xlane.f32.xlu1 %v1935_v3 }
 0x2c3   :  { %v4021_v58 = vadd.f32 %v3985_v55, %v1755_v21  ;;  %v2783_v26 = vpop.f32.mrb[70].mxu1  ;;  %1968 = vadd.xlane.f32.xlu0 %v1934_v48 }
 0x2c4   :  { %v1770_v12 = vadd.f32 %v2783_v26, %v3743_v8  ;;  %v1764_v27 = vpop.f32.mrb[71].mxu1  ;;  %v1937_v51 = vmul.f32 %v4018_v41, %v4018_v41 }
 0x2c5   :  { %v1765_v0 = vadd.f32 %v3733_v49, %v1764_v27  ;;  %v1936_v33 = vmul.f32 %v4021_v58, %v4021_v58 }
 0x2c6   :  { %v4030_v36 = vadd.f32 %v3985_v55, %v1770_v12  ;;  %1974 = vadd.xlane.f32.xlu1 %v1937_v51 }
 0x2c7   :  { %v4033_v3 = vadd.f32 %v3985_v55, %v1765_v0  ;;  %v2786_v21 = vpop.f32.mrb[72].mxu1  ;;  %1972 = vadd.xlane.f32.xlu0 %v1936_v33 }
 0x2c8   :  { %v1780_v8 = vadd.f32 %v2786_v21, %v3766_v4  ;;  %v1774_v48 = vpop.f32.mrb[73].mxu1  ;;  %v1939_v26 = vmul.f32 %v4030_v36, %v4030_v36 }
 0x2c9   :  { %4336 = vst [vmem:[#allocation31_spill] sm:$0xff] %v4033_v3  ;;  %v1775_v49 = vadd.f32 %v1774_v48, %v3758_v47  ;;  %v1938_v27 = vmul.f32 %v4033_v3, %v4033_v3 }
 0x2ca   :  { %v4042_v12 = vadd.f32 %v3985_v55, %v1780_v8  ;;  %1978 = vadd.xlane.f32.xlu1 %v1939_v26 }
 0x2cb   :  { %v4045_v51 = vadd.f32 %v3985_v55, %v1775_v49  ;;  %v2789_v0 = vpop.f32.mrb[74].mxu1  ;;  %1976 = vadd.xlane.f32.xlu0 %v1938_v27 }
 0x2cc   :  { %v1790_v4 = vadd.f32 %v2789_v0, %v3763_v29  ;;  %v1784_v33 = vpop.f32.mrb[75].mxu1  ;;  %v1941_v21 = vmul.f32 %v4042_v12, %v4042_v12 }
 0x2cd   :  { %v1785_v47 = vadd.f32 %v3756_v42, %v1784_v33  ;;  %v1940_v48 = vmul.f32 %v4045_v51, %v4045_v51 }
 0x2ce   :  { %v4054_v8 = vadd.f32 %v3985_v55, %v1790_v4  ;;  %1982 = vadd.xlane.f32.xlu1 %v1941_v21 }
 0x2cf   :  { %v4057_v26 = vadd.f32 %v3985_v55, %v1785_v47  ;;  %v1254_v49 = vpop.xlane.xlu0 %1253  ;;  %v2792_v27 = vpop.f32.mrb[76].mxu1  ;;  %1980 = vadd.xlane.f32.xlu0 %v1940_v48 }
 0x2d0   :  { %4337 = vst [vmem:[#allocation32_spill] sm:$0xff] %v4054_v8  ;;  %v1316_v29 = vmax.f32 %v1254_v49, 1e-24  ;;  %v1800_v0 = vadd.f32 %v2792_v27, %v3786_v53  ;;  %v1794_v3 = vpop.f32.mrb[77].mxu1  ;;  %v1943_v42 = vmul.f32 %v4054_v8, %v4054_v8 }
 0x2d1   :  { %v1795_v33 = vadd.f32 %v1794_v3, %v3778_v40  ;;  %v1942_v4 = vmul.f32 %v4057_v26, %v4057_v26 }
 0x2d2   :  { %3040 = vrsqrt.f32 %v1316_v29  ;;  %v4066_v21 = vadd.f32 %v3985_v55, %v1800_v0  ;;  %1986 = vadd.xlane.f32.xlu1 %v1943_v42 }
 0x2d3   :  { %v4069_v47 = vadd.f32 %v3985_v55, %v1795_v33  ;;  %v2795_v48 = vpop.f32.mrb[78].mxu1  ;;  %1984 = vadd.xlane.f32.xlu0 %v1942_v4  ;;  %v1252_v53 = vpop.xlane.xlu0 %1251 }
 0x2d4   :  { %v1810_v49 = vadd.f32 %v2795_v48, %v3783_v35  ;;  %v1315_v27 = vmax.f32 %v1252_v53, 1e-24  ;;  %v1804_v8 = vpop.f32.mrb[79].mxu1  ;;  %v1945_v40 = vmul.f32 %v4066_v21, %v4066_v21 }
 0x2d5   :  { %v1805_v3 = vadd.f32 %v3776_v37, %v1804_v8  ;;  %v1944_v29 = vmul.f32 %v4069_v47, %v4069_v47 }
 0x2d6   :  { %v4078_v0 = vadd.f32 %v3985_v55, %v1810_v49  ;;  %3042 = vrsqrt.f32 %v1315_v27  ;;  %1990 = vadd.xlane.f32.xlu1 %v1945_v40 }
 0x2d7   :  { %v4081_v42 = vadd.f32 %v3985_v55, %v1805_v3  ;;  %v1258_v33 = vpop.xlane.xlu1 %1257  ;;  %v2798_v35 = vpop.f32.mrb[80].mxu1  ;;  %1988 = vadd.xlane.f32.xlu0 %v1944_v29 }
 0x2d8   :  { %4338 = vst [vmem:[#allocation30_spill] sm:$0xff] %v4078_v0  ;;  %v1318_v4 = vmax.f32 %v1258_v33, 1e-24  ;;  %v1820_v48 = vadd.f32 %v2798_v35, %v3806_v11  ;;  %v1814_v53 = vpop.f32.mrb[81].mxu1  ;;  %v1947_v37 = vmul.f32 %v4078_v0, %v4078_v0 }
 0x2d9   :  { %v1815_v8 = vadd.f32 %v1814_v53, %v3800_v6  ;;  %v1946_v49 = vmul.f32 %v4081_v42, %v4081_v42 }
 0x2da   :  { %3044 = vrsqrt.f32 %v1318_v4  ;;  %v4090_v27 = vadd.f32 %v3985_v55, %v1820_v48  ;;  %1994 = vadd.xlane.f32.xlu1 %v1947_v37 }
 0x2db   :  { %v4093_v40 = vadd.f32 %v3985_v55, %v1815_v8  ;;  %v2801_v3 = vpop.f32.mrb[82].mxu1  ;;  %v1256_v29 = vpop.xlane.xlu1 %1255  ;;  %1992 = vadd.xlane.f32.xlu0 %v1946_v49 }
 0x2dc   :  { %v3041_v11 = vpop.eup %3040  ;;  %v1830_v33 = vadd.f32 %v2801_v3, %v3803_v57  ;;  %v1317_v35 = vmax.f32 %v1256_v29, 1e-24  ;;  %v1824_v0 = vpop.f32.mrb[83].mxu1  ;;  %v1949_v6 = vmul.f32 %v4090_v27, %v4090_v27 }
 0x2dd   :  { %v1380_v4 = vmul.f32 %v3041_v11, %v3749_v14  ;;  %v1825_v48 = vadd.f32 %v3798_v32, %v1824_v0  ;;  %v1948_v53 = vmul.f32 %v4093_v40, %v4093_v40 }
 0x2de   :  { %v4103_v37 = vadd.f32 %v3985_v55, %v1830_v33  ;;  %3046 = vrsqrt.f32 %v1317_v35  ;;  %1998 = vadd.xlane.f32.xlu1 %v1949_v6 }
 0x2df   :  { %1412 = vst [vmem:[#allocation13 + $0x8] sm:$0xff] %v1380_v4  ;;  %v4106_v57 = vadd.f32 %v3985_v55, %v1825_v48  ;;  %v2804_v8 = vpop.f32.mrb[84].mxu1  ;;  %v1262_v49 = vpop.xlane.xlu1 %1261  ;;  %1996 = vadd.xlane.f32.xlu0 %v1948_v53 }
 0x2e0   :  { %v3043_v3 = vpop.eup %3042  ;;  %v1840_v14 = vadd.f32 %v2804_v8, %v3826_v28  ;;  %v1320_v29 = vmax.f32 %v1262_v49, 1e-24  ;;  %v1834_v32 = vpop.f32.mrb[85].mxu1  ;;  %v1951_v11 = vmul.f32 %v4103_v37, %v4103_v37 }
 0x2e1   :  { %v1260_v0 = vpop.xlane.xlu0 %1259  ;;  %v1379_v33 = vmul.f32 %v3043_v3, %v3752_v20  ;;  %v1835_v35 = vadd.f32 %v1834_v32, %v3820_v61  ;;  %v1950_v4 = vmul.f32 %v4106_v57, %v4106_v57 }
 0x2e2   :  { %v1319_v6 = vmax.f32 %v1260_v0, 1e-24  ;;  %v4116_v48 = vadd.f32 %v3985_v55, %v1840_v14  ;;  %3048 = vrsqrt.f32 %v1320_v29  ;;  %2002 = vadd.xlane.f32.xlu1 %v1951_v11 }
 0x2e3   :  { %1411 = vst [vmem:[#allocation13] sm:$0xff] %v1379_v33  ;;  %v4119_v28 = vadd.f32 %v3985_v55, %v1835_v35  ;;  %v2807_v53 = vpop.f32.mrb[86].mxu1  ;;  %2000 = vadd.xlane.f32.xlu0 %v1950_v4 }
 0x2e4   :  { %3050 = vrsqrt.f32 %v1319_v6  ;;  %v3045_v8 = vpop.eup %3044  ;;  %v1850_v20 = vadd.f32 %v2807_v53, %v3823_v56  ;;  %v1844_v61 = vpop.f32.mrb[87].mxu1  ;;  %v1953_v49 = vmul.f32 %v4116_v48, %v4116_v48 }
 0x2e5   :  { %v1382_v3 = vmul.f32 %v3045_v8, %v3769_v34  ;;  %v1845_v14 = vadd.f32 %v3818_v7, %v1844_v61  ;;  %v1952_v29 = vmul.f32 %v4119_v28, %v4119_v28 }
 0x2e6   :  { %v4129_v32 = vadd.f32 %v3985_v55, %v1850_v20  ;;  %2006 = vadd.xlane.f32.xlu1 %v1953_v49 }
 0x2e7   :  { %1414 = vst [vmem:[#allocation13 + $0x18] sm:$0xff] %v1382_v3  ;;  %v4132_v0 = vadd.f32 %v3985_v55, %v1845_v14  ;;  %v2810_v56 = vpop.f32.mrb[88].mxu1  ;;  %v1266_v11 = vpop.xlane.xlu1 %1265  ;;  %2004 = vadd.xlane.f32.xlu0 %v1952_v29 }
 0x2e8   :  { %v3047_v33 = vpop.eup %3046  ;;  %v1860_v35 = vadd.f32 %v2810_v56, %v3846_v22  ;;  %v1322_v34 = vmax.f32 %v1266_v11, 1e-24  ;;  %v1854_v6 = vpop.f32.mrb[89].mxu1  ;;  %v1955_v4 = vmul.f32 %v4129_v32, %v4129_v32 }
 0x2e9   :  { %v1264_v7 = vpop.xlane.xlu0 %1263  ;;  %v1381_v53 = vmul.f32 %v3047_v33, %v3772_v9  ;;  %v1855_v8 = vadd.f32 %v1854_v6, %v3840_v16  ;;  %v1954_v61 = vmul.f32 %v4132_v0, %v4132_v0 }
 0x2ea   :  { %v1321_v20 = vmax.f32 %v1264_v7, 1e-24  ;;  %v4142_v49 = vadd.f32 %v3985_v55, %v1860_v35  ;;  %3052 = vrsqrt.f32 %v1322_v34  ;;  %2010 = vadd.xlane.f32.xlu1 %v1955_v4 }
 0x2eb   :  { %1413 = vst [vmem:[#allocation13 + $0x10] sm:$0xff] %v1381_v53  ;;  %v4145_v22 = vadd.f32 %v3985_v55, %v1855_v8  ;;  %v2813_v3 = vpop.f32.mrb[90].mxu1  ;;  %2008 = vadd.xlane.f32.xlu0 %v1954_v61 }
 0x2ec   :  { %3054 = vrsqrt.f32 %v1321_v20  ;;  %v3049_v14 = vpop.eup %3048  ;;  %v1870_v9 = vadd.f32 %v2813_v3, %v3843_v31  ;;  %v1864_v16 = vpop.f32.mrb[91].mxu1  ;;  %v1957_v29 = vmul.f32 %v4142_v49, %v4142_v49 }
 0x2ed   :  { %v1384_v11 = vmul.f32 %v3049_v14, %v3789_v54  ;;  %v1865_v33 = vadd.f32 %v3838_v46, %v1864_v16  ;;  %v1956_v35 = vmul.f32 %v4145_v22, %v4145_v22 }
 0x2ee   :  { %v3051_v56 = vpop.eup %3050  ;;  %v4156_v6 = vadd.f32 %v3985_v55, %v1870_v9  ;;  %2014 = vadd.xlane.f32.xlu1 %v1957_v29 }
 0x2ef   :  { %v1383_v34 = vmul.f32 %v3051_v56, %v3792_v62  ;;  %1416 = vst [vmem:[#allocation13 + $0x28] sm:$0xff] %v1384_v11  ;;  %v4159_v31 = vadd.f32 %v3985_v55, %v1865_v33  ;;  %v2816_v7 = vpop.f32.mrb[92].mxu1  ;;  %v1270_v4 = vpop.xlane.xlu1 %1269  ;;  %2012 = vadd.xlane.f32.xlu0 %v1956_v35 }
 0x2f0   :  { %v1880_v54 = vadd.f32 %v2816_v7, %v3866_v13  ;;  %v1324_v46 = vmax.f32 %v1270_v4, 1e-24  ;;  %v1874_v53 = vpop.f32.mrb[93].mxu1  ;;  %v1268_v8 = vpop.xlane.xlu0 %1267  ;;  %v1959_v62 = vmul.f32 %v4156_v6, %v4156_v6 }
 0x2f1   :  { %1415 = vst [vmem:[#allocation13 + $0x20] sm:$0xff] %v1383_v34  ;;  %v1875_v20 = vadd.f32 %v1874_v53, %v3860_v38  ;;  %v1323_v61 = vmax.f32 %v1268_v8, 1e-24  ;;  %v1958_v3 = vmul.f32 %v4159_v31, %v4159_v31 }
 0x2f2   :  { %v4168_v14 = vadd.f32 %v3985_v55, %v1880_v54  ;;  %3056 = vrsqrt.f32 %v1324_v46  ;;  %2018 = vadd.xlane.f32.xlu1 %v1959_v62 }
 0x2f3   :  { %v4171_v9 = vadd.f32 %v3985_v55, %v1875_v20  ;;  %3058 = vrsqrt.f32 %v1323_v61  ;;  %v2819_v13 = vpop.f32.mrb[94].mxu1  ;;  %2016 = vadd.xlane.f32.xlu0 %v1958_v3 }
 0x2f4   :  { %v3053_v16 = vpop.eup %3052  ;;  %v1890_v29 = vadd.f32 %v2819_v13, %v3863_v60  ;;  %v1884_v56 = vpop.f32.mrb[95].mxu1  ;;  %v1961_v38 = vmul.f32 %v4168_v14, %v4168_v14 }
 0x2f5   :  { %v1386_v33 = vmul.f32 %v3053_v16, %v3809_v18  ;;  %v1885_v35 = vadd.f32 %v3858_v43, %v1884_v56  ;;  %v1960_v34 = vmul.f32 %v4171_v9, %v4171_v9 }
 0x2f6   :  { %v3055_v11 = vpop.eup %3054  ;;  %v4182_v4 = vadd.f32 %v3985_v55, %v1890_v29  ;;  %2022 = vadd.xlane.f32.xlu1 %v1961_v38 }
 0x2f7   :  { %v1385_v7 = vmul.f32 %v3055_v11, %v3812_v52  ;;  %1418 = vst [vmem:[#allocation13 + $0x38] sm:$0xff] %v1386_v33  ;;  %v4185_v60 = vadd.f32 %v3985_v55, %v1885_v35  ;;  %v1274_v54 = vpop.xlane.xlu1 %1273  ;;  %2020 = vadd.xlane.f32.xlu0 %v1960_v34 }
 0x2f8   :  { %v1326_v46 = vmax.f32 %v1274_v54, 1e-24  ;;  %v1272_v18 = vpop.xlane.xlu0 %1271  ;;  %v1963_v43 = vmul.f32 %v4182_v4, %v4182_v4 }
 0x2f9   :  { %1417 = vst [vmem:[#allocation13 + $0x30] sm:$0xff] %v1385_v7  ;;  %v1325_v53 = vmax.f32 %v1272_v18, 1e-24  ;;  %v1962_v52 = vmul.f32 %v4185_v60, %v4185_v60 }
 0x2fa   :  { %3060 = vrsqrt.f32 %v1326_v46  ;;  %2026 = vadd.xlane.f32.xlu1 %v1963_v43 }
 0x2fb   :  { %3062 = vrsqrt.f32 %v1325_v53  ;;  %2024 = vadd.xlane.f32.xlu0 %v1962_v52 }
 0x2fc   :  { %v3057_v8 = vpop.eup %3056 }
 0x2fd   :  { %v3059_v62 = vpop.eup %3058  ;;  %v1388_v55 = vmul.f32 %v3057_v8, %v3829_v1 }
 0x2fe   :  { %v1387_v20 = vmul.f32 %v3059_v62, %v3832_v23 }
 0x2ff   :  { %1420 = vst [vmem:[#allocation13 + $0x48] sm:$0xff] %v1388_v55  ;;  %v1278_v61 = vpop.xlane.xlu1 %1277 }
 0x300   :  { %1419 = vst [vmem:[#allocation13 + $0x40] sm:$0xff] %v1387_v20  ;;  %v1328_v3 = vmax.f32 %v1278_v61, 1e-24  ;;  %v1276_v13 = vpop.xlane.xlu0 %1275 }
 0x301   :  { %v1327_v16 = vmax.f32 %v1276_v13, 1e-24 }
 0x302   :  { %3064 = vrsqrt.f32 %v1328_v3 }
 0x303   :  { %3066 = vrsqrt.f32 %v1327_v16 }
 0x304   :  { %v3061_v29 = vpop.eup %3060 }
 0x305   :  { %v3063_v56 = vpop.eup %3062  ;;  %v1390_v38 = vmul.f32 %v3061_v29, %v3849_v39 }
 0x306   :  { %v1389_v11 = vmul.f32 %v3063_v56, %v3852_v17 }
 0x307   :  { %1422 = vst [vmem:[#allocation13 + $0x58] sm:$0xff] %v1390_v38  ;;  %v1282_v33 = vpop.xlane.xlu1 %1281 }
 0x308   :  { %1421 = vst [vmem:[#allocation13 + $0x50] sm:$0xff] %v1389_v11  ;;  %v1330_v1 = vmax.f32 %v1282_v33, 1e-24  ;;  %v1280_v35 = vpop.xlane.xlu0 %1279  ;;  %v4339_v33 = vld [vmem:[#allocation34_spill] sm:$0xff] }
 0x309   :  { %v1329_v23 = vmax.f32 %v1280_v35, 1e-24  ;;  %v4340_v35 = vld [vmem:[#allocation35_spill] sm:$0xff] }
 0x30a   :  { %3068 = vrsqrt.f32 %v1330_v1 }
 0x30b   :  { %3070 = vrsqrt.f32 %v1329_v23 }
 0x30c   :  { %v3065_v34 = vpop.eup %3064 }
 0x30d   :  { %v3067_v7 = vpop.eup %3066  ;;  %v1392_v54 = vmul.f32 %v3065_v34, %v3869_v15 }
 0x30e   :  { %v1391_v46 = vmul.f32 %v3067_v7, %v3872_v44 }
 0x30f   :  { %1424 = vst [vmem:[#allocation13 + $0x68] sm:$0xff] %v1392_v54  ;;  %v1286_v18 = vpop.xlane.xlu1 %1285 }
 0x310   :  { %1423 = vst [vmem:[#allocation13 + $0x60] sm:$0xff] %v1391_v46  ;;  %v1332_v39 = vmax.f32 %v1286_v18, 1e-24  ;;  %v1284_v43 = vpop.xlane.xlu0 %1283  ;;  %v4341_v18 = vld [vmem:[#allocation25_spill] sm:$0xff] }
 0x311   :  { %v1331_v17 = vmax.f32 %v1284_v43, 1e-24  ;;  %v4342_v43 = vld [vmem:[#allocation23_spill] sm:$0xff] }
 0x312   :  { %3072 = vrsqrt.f32 %v1332_v39 }
 0x313   :  { %3074 = vrsqrt.f32 %v1331_v17 }
 0x314   :  { %v3069_v53 = vpop.eup %3068 }
 0x315   :  { %v3071_v52 = vpop.eup %3070  ;;  %v1394_v8 = vmul.f32 %v3069_v53, %v3881_v2 }
 0x316   :  { %v1393_v62 = vmul.f32 %v3071_v52, %v3884_v5 }
 0x317   :  { %1426 = vst [vmem:[#allocation13 + $0x78] sm:$0xff] %v1394_v8  ;;  %v1290_v55 = vpop.xlane.xlu1 %1289 }
 0x318   :  { %1425 = vst [vmem:[#allocation13 + $0x70] sm:$0xff] %v1393_v62  ;;  %v1334_v15 = vmax.f32 %v1290_v55, 1e-24  ;;  %v1288_v20 = vpop.xlane.xlu0 %1287 }
 0x319   :  { %v1333_v44 = vmax.f32 %v1288_v20, 1e-24  ;;  %v4343_v20 = vld [vmem:[#allocation24_spill] sm:$0xff] }
 0x31a   :  { %3076 = vrsqrt.f32 %v1334_v15 }
 0x31b   :  { %3078 = vrsqrt.f32 %v1333_v44 }
 0x31c   :  { %v3073_v61 = vpop.eup %3072 }
 0x31d   :  { %v3075_v3 = vpop.eup %3074  ;;  %v1396_v13 = vmul.f32 %v3073_v61, %v3893_v45  ;;  %v4344_v61 = vld [vmem:[#allocation22_spill] sm:$0xff] }
 0x31e   :  { %v1395_v16 = vmul.f32 %v3075_v3, %v3896_v24 }
 0x31f   :  { %1428 = vst [vmem:[#allocation13 + $0x88] sm:$0xff] %v1396_v13  ;;  %v1294_v29 = vpop.xlane.xlu1 %1293 }
 0x320   :  { %1427 = vst [vmem:[#allocation13 + $0x80] sm:$0xff] %v1395_v16  ;;  %v1336_v2 = vmax.f32 %v1294_v29, 1e-24  ;;  %v1292_v56 = vpop.xlane.xlu0 %1291 }
 0x321   :  { %v1335_v5 = vmax.f32 %v1292_v56, 1e-24 }
 0x322   :  { %3080 = vrsqrt.f32 %v1336_v2 }
 0x323   :  { %3082 = vrsqrt.f32 %v1335_v5 }
 0x324   :  { %v3077_v38 = vpop.eup %3076 }
 0x325   :  { %v3079_v11 = vpop.eup %3078  ;;  %v1398_v1 = vmul.f32 %v3077_v38, %v4339_v33  ;;  %v4345_v38 = vld [vmem:[#allocation29_spill] sm:$0xff]  ;;  %v4346_v33 = vld [vmem:[#allocation27_spill] sm:$0xff] }
 0x326   :  { %v1397_v23 = vmul.f32 %v3079_v11, %v4340_v35 }
 0x327   :  { %1430 = vst [vmem:[#allocation13 + $0x98] sm:$0xff] %v1398_v1  ;;  %v1298_v34 = vpop.xlane.xlu1 %1297 }
 0x328   :  { %1429 = vst [vmem:[#allocation13 + $0x90] sm:$0xff] %v1397_v23  ;;  %v1338_v45 = vmax.f32 %v1298_v34, 1e-24  ;;  %v1296_v7 = vpop.xlane.xlu0 %1295 }
 0x329   :  { %v1337_v24 = vmax.f32 %v1296_v7, 1e-24 }
 0x32a   :  { %3084 = vrsqrt.f32 %v1338_v45 }
 0x32b   :  { %3086 = vrsqrt.f32 %v1337_v24 }
 0x32c   :  { %v3081_v54 = vpop.eup %3080 }
 0x32d   :  { %v3083_v46 = vpop.eup %3082  ;;  %v1400_v39 = vmul.f32 %v3081_v54, %v4341_v18  ;;  %v4347_v54 = vld [vmem:[#allocation28_spill] sm:$0xff]  ;;  %v4348_v18 = vld [vmem:[#allocation26_spill] sm:$0xff] }
 0x32e   :  { %v1399_v17 = vmul.f32 %v3083_v46, %v4342_v43 }
 0x32f   :  { %1432 = vst [vmem:[#allocation13 + $0xa8] sm:$0xff] %v1400_v39  ;;  %v1302_v53 = vpop.xlane.xlu1 %1301 }
 0x330   :  { %1431 = vst [vmem:[#allocation13 + $0xa0] sm:$0xff] %v1399_v17  ;;  %v1340_v52 = vmax.f32 %v1302_v53, 1e-24  ;;  %v1300_v8 = vpop.xlane.xlu0 %1299 }
 0x331   :  { %v1339_v62 = vmax.f32 %v1300_v8, 1e-24 }
 0x332   :  { %3088 = vrsqrt.f32 %v1340_v52 }
 0x333   :  { %3090 = vrsqrt.f32 %v1339_v62 }
 0x334   :  { %v3085_v55 = vpop.eup %3084 }
 0x335   :  { %v3087_v15 = vpop.eup %3086  ;;  %v1402_v44 = vmul.f32 %v3085_v55, %v4343_v20 }
 0x336   :  { %v1401_v3 = vmul.f32 %v3087_v15, %v4344_v61 }
 0x337   :  { %1434 = vst [vmem:[#allocation13 + $0xb8] sm:$0xff] %v1402_v44  ;;  %v1306_v13 = vpop.xlane.xlu1 %1305  ;;  %v4349_v44 = vld [vmem:[#allocation33_spill] sm:$0xff] }
 0x338   :  { %1433 = vst [vmem:[#allocation13 + $0xb0] sm:$0xff] %v1401_v3  ;;  %v1342_v16 = vmax.f32 %v1306_v13, 1e-24  ;;  %v1304_v29 = vpop.xlane.xlu0 %1303 }
 0x339   :  { %v1341_v2 = vmax.f32 %v1304_v29, 1e-24 }
 0x33a   :  { %3092 = vrsqrt.f32 %v1342_v16 }
 0x33b   :  { %3094 = vrsqrt.f32 %v1341_v2 }
 0x33c   :  { %v3089_v56 = vpop.eup %3088 }
 0x33d   :  { %v3091_v5 = vpop.eup %3090  ;;  %v1404_v11 = vmul.f32 %v3089_v56, %v4345_v38 }
 0x33e   :  { %v1403_v1 = vmul.f32 %v3091_v5, %v4346_v33 }
 0x33f   :  { %1436 = vst [vmem:[#allocation13 + $0xc8] sm:$0xff] %v1404_v11  ;;  %v1310_v35 = vpop.xlane.xlu1 %1309 }
 0x340   :  { %1435 = vst [vmem:[#allocation13 + $0xc0] sm:$0xff] %v1403_v1  ;;  %v1344_v23 = vmax.f32 %v1310_v35, 1e-24  ;;  %v1308_v34 = vpop.xlane.xlu0 %1307 }
 0x341   :  { %v1343_v45 = vmax.f32 %v1308_v34, 1e-24 }
 0x342   :  { %3096 = vrsqrt.f32 %v1344_v23 }
 0x343   :  { %3098 = vrsqrt.f32 %v1343_v45 }
 0x344   :  { %v3093_v7 = vpop.eup %3092 }
 0x345   :  { %v3095_v24 = vpop.eup %3094  ;;  %v1406_v46 = vmul.f32 %v3093_v7, %v4347_v54 }
 0x346   :  { %v1405_v39 = vmul.f32 %v3095_v24, %v4348_v18 }
 0x347   :  { %1438 = vst [vmem:[#allocation13 + $0xd8] sm:$0xff] %v1406_v46  ;;  %v1314_v43 = vpop.xlane.xlu1 %1313 }
 0x348   :  { %1437 = vst [vmem:[#allocation13 + $0xd0] sm:$0xff] %v1405_v39  ;;  %v1346_v17 = vmax.f32 %v1314_v43, 1e-24  ;;  %v1312_v53 = vpop.xlane.xlu0 %1311 }
 0x349   :  { %v1345_v52 = vmax.f32 %v1312_v53, 1e-24 }
 0x34a   :  { %3100 = vrsqrt.f32 %v1346_v17 }
 0x34b   :  { %3102 = vrsqrt.f32 %v1345_v52  ;;  %v1967_v8 = vpop.xlane.xlu1 %1966 }
 0x34c   :  { %v3097_v62 = vpop.eup %3096  ;;  %v2029_v55 = vmax.f32 %v1967_v8, 1e-24  ;;  %v1965_v15 = vpop.xlane.xlu0 %1964 }
 0x34d   :  { %v3099_v20 = vpop.eup %3098  ;;  %v1408_v61 = vmul.f32 %v3097_v62, %v4349_v44  ;;  %v2028_v3 = vmax.f32 %v1965_v15, 1e-24 }
 0x34e   :  { %v1407_v13 = vmul.f32 %v3099_v20, %v3968_v19  ;;  %3104 = vrsqrt.f32 %v2029_v55 }
 0x34f   :  { %1440 = vst [vmem:[#allocation13 + $0xe8] sm:$0xff] %v1408_v61  ;;  %3106 = vrsqrt.f32 %v2028_v3  ;;  %v1971_v16 = vpop.xlane.xlu1 %1970 }
 0x350   :  { %1439 = vst [vmem:[#allocation13 + $0xe0] sm:$0xff] %v1407_v13  ;;  %v2031_v29 = vmax.f32 %v1971_v16, 1e-24  ;;  %v1969_v2 = vpop.xlane.xlu0 %1968 }
 0x351   :  { %v2030_v56 = vmax.f32 %v1969_v2, 1e-24 }
 0x352   :  { %3108 = vrsqrt.f32 %v2031_v29 }
 0x353   :  { %3110 = vrsqrt.f32 %v2030_v56  ;;  %v1975_v5 = vpop.xlane.xlu1 %1974 }
 0x354   :  { %v3101_v38 = vpop.eup %3100  ;;  %v2033_v11 = vmax.f32 %v1975_v5, 1e-24  ;;  %v1973_v33 = vpop.xlane.xlu0 %1972 }
 0x355   :  { %v3103_v1 = vpop.eup %3102  ;;  %v1410_v35 = vmul.f32 %v3101_v38, %v3977_v25  ;;  %v2032_v19 = vmax.f32 %v1973_v33, 1e-24 }
 0x356   :  { %v1409_v23 = vmul.f32 %v3103_v1, %v3980_v10  ;;  %3112 = vrsqrt.f32 %v2033_v11 }
 0x357   :  { %1442 = vst [vmem:[#allocation13 + $0xf8] sm:$0xff] %v1410_v35  ;;  %3114 = vrsqrt.f32 %v2032_v19  ;;  %v1979_v34 = vpop.xlane.xlu1 %1978 }
 0x358   :  { %v3105_v45 = vpop.eup %3104  ;;  %1441 = vst [vmem:[#allocation13 + $0xf0] sm:$0xff] %v1409_v23  ;;  %v2035_v7 = vmax.f32 %v1979_v34, 1e-24  ;;  %v1977_v24 = vpop.xlane.xlu0 %1976 }
 0x359   :  { %v3107_v54 = vpop.eup %3106  ;;  %v2093_v46 = vmul.f32 %v3105_v45, %v3994_v59  ;;  %v2034_v18 = vmax.f32 %v1977_v24, 1e-24 }
 0x35a   :  { %3311 = shalt.err (!%p3308_p10)
}
 0x35b   :  { %s3312_s23 = scalar_lea.hbm %s4285_s8, 4096 }
 0x35c   :  { %p3313_p11 = scmp.ne.s32.totalorder %s4285_s8, %s3312_s23  ;;  %p3316_p12 = scmp.lt.u32.totalorder %s3312_s23, %s4285_s8 }
 0x35e   :  { %p3318_p13 = pnand %p3316_p12, %p3313_p11 }
 0x360   :  { %3321 = shalt.err (!%p3318_p13)
}
 0x361   :  { %2167 = dma.vmem_to_hbm [thread:$0]  %s2162_s19, 4096, %s4285_s8, [#allocation4], %s3361_s10, %s3361_s10, %s3362_s14   ;;  %v2092_v25 = vmul.f32 %v3107_v54, %v3997_v50  ;;  %3116 = vrsqrt.f32 %v2035_v7  ;;  %2125 = vst [vmem:[#allocation14 + $0x8] sm:$0xff] %v2093_v46  ;;  %v1983_v10 = vpop.xlane.xlu1 %1982  ;;  %v3109_v59 = vpop.eup %3108  ;;  %v4350_v5 = vld [vmem:[#allocation31_spill] sm:$0xff]  ;;  %v4351_v54 = vld [vmem:[#allocation32_spill] sm:$0xff] }
 0x362   :  { %3118 = vrsqrt.f32 %v2034_v18  ;;  %v2037_v39 = vmax.f32 %v1983_v10, 1e-24  ;;  %v1981_v43 = vpop.xlane.xlu0 %1980  ;;  %v3111_v17 = vpop.eup %3110  ;;  %v2095_v53 = vmul.f32 %v3109_v59, %v4006_v63  ;;  %s3367_s8 = smov [#allocation14]  }
 0x363   :  { %2124 = vst [vmem:[#allocation14] sm:$0xff] %v2092_v25  ;;  %v2036_v52 = vmax.f32 %v1981_v43, 1e-24  ;;  %v2094_v8 = vmul.f32 %v3111_v17, %v4009_v30  ;;  %v3113_v55 = vpop.eup %3112  ;;  %s2173_s29 = sshll.u32 %s3367_s8, 4  ;;  %s2174_s29 = int_to_ptr.vmem [resolvable:$true] %s2173_s29 }
 0x364   :  { %3120 = vrsqrt.f32 %v2037_v39  ;;  %2127 = vst [vmem:[#allocation14 + $0x18] sm:$0xff] %v2095_v53  ;;  %v3115_v20 = vpop.eup %3114  ;;  %v2097_v44 = vmul.f32 %v3113_v55, %v4018_v41  ;;  %s3322_s11 = scalar_lea.vmem %s2174_s29, 4096  ;;  %p3327_p1 = scmp.lt.s32.totalorder %s2174_s29, %s2174_s29 }
 0x365   :  { %3122 = vrsqrt.f32 %v2036_v52  ;;  %v1987_v62 = vpop.xlane.xlu1 %1986  ;;  %2126 = vst [vmem:[#allocation14 + $0x10] sm:$0xff] %v2094_v8  ;;  %v2096_v3 = vmul.f32 %v3115_v20, %v4021_v58  ;;  %p3323_p0 = scmp.ne.s32.totalorder %s2174_s29, %s3322_s11  ;;  %p3328_p2 = scmp.lt.s32.totalorder %s3322_s11, %s3322_s11 }
 0x366   :  { %v2039_v50 = vmax.f32 %v1987_v62, 1e-24  ;;  %v1985_v15 = vpop.xlane.xlu0 %1984  ;;  %2129 = vst [vmem:[#allocation14 + $0x28] sm:$0xff] %v2097_v44 }
 0x367   :  { %v2038_v61 = vmax.f32 %v1985_v15, 1e-24  ;;  %2128 = vst [vmem:[#allocation14 + $0x20] sm:$0xff] %v2096_v3  ;;  %p3329_p3 = por %p3328_p2, %p3327_p1 }
 0x368   :  { %3124 = vrsqrt.f32 %v2039_v50  ;;  %v4352_v50 = vld [vmem:[#allocation30_spill] sm:$0xff] }
 0x369   :  { %3126 = vrsqrt.f32 %v2038_v61  ;;  %v1991_v63 = vpop.xlane.xlu1 %1990  ;;  %p3330_p4 = pnand %p3329_p3, %p3323_p0 }
 0x36a   :  { %v2041_v30 = vmax.f32 %v1991_v63, 1e-24  ;;  %v1989_v16 = vpop.xlane.xlu0 %1988 }
 0x36b   :  { %v3117_v13 = vpop.eup %3116  ;;  %v2040_v56 = vmax.f32 %v1989_v16, 1e-24 }
 0x36c   :  { %v3119_v29 = vpop.eup %3118  ;;  %v2099_v2 = vmul.f32 %v3117_v13, %v4030_v36  ;;  %3128 = vrsqrt.f32 %v2041_v30 }
 0x36d   :  { %v2098_v38 = vmul.f32 %v3119_v29, %v4350_v5  ;;  %3130 = vrsqrt.f32 %v2040_v56  ;;  %v1995_v41 = vpop.xlane.xlu1 %1994 }
 0x36e   :  { %2131 = vst [vmem:[#allocation14 + $0x38] sm:$0xff] %v2099_v2  ;;  %v3121_v11 = vpop.eup %3120  ;;  %v2043_v58 = vmax.f32 %v1995_v41, 1e-24  ;;  %v1993_v33 = vpop.xlane.xlu0 %1992 }
 0x36f   :  { %2130 = vst [vmem:[#allocation14 + $0x30] sm:$0xff] %v2098_v38  ;;  %v3123_v1 = vpop.eup %3122  ;;  %v2101_v35 = vmul.f32 %v3121_v11, %v4042_v12  ;;  %v2042_v19 = vmax.f32 %v1993_v33, 1e-24 }
 0x370   :  { %v2100_v23 = vmul.f32 %v3123_v1, %v4045_v51  ;;  %3132 = vrsqrt.f32 %v2043_v58 }
 0x371   :  { %2133 = vst [vmem:[#allocation14 + $0x48] sm:$0xff] %v2101_v35  ;;  %3134 = vrsqrt.f32 %v2042_v19  ;;  %v1999_v36 = vpop.xlane.xlu1 %1998 }
 0x372   :  { %v3125_v34 = vpop.eup %3124  ;;  %2132 = vst [vmem:[#allocation14 + $0x40] sm:$0xff] %v2100_v23  ;;  %v2045_v45 = vmax.f32 %v1999_v36, 1e-24  ;;  %v1997_v7 = vpop.xlane.xlu0 %1996 }
 0x373   :  { %v3127_v24 = vpop.eup %3126  ;;  %v2103_v46 = vmul.f32 %v3125_v34, %v4351_v54  ;;  %v2044_v18 = vmax.f32 %v1997_v7, 1e-24 }
 0x374   :  { %v2102_v25 = vmul.f32 %v3127_v24, %v4057_v26  ;;  %3136 = vrsqrt.f32 %v2045_v45 }
 0x375   :  { %2135 = vst [vmem:[#allocation14 + $0x58] sm:$0xff] %v2103_v46  ;;  %3138 = vrsqrt.f32 %v2044_v18  ;;  %v2003_v12 = vpop.xlane.xlu1 %2002 }
 0x376   :  { %v3129_v10 = vpop.eup %3128  ;;  %2134 = vst [vmem:[#allocation14 + $0x50] sm:$0xff] %v2102_v25  ;;  %v2047_v51 = vmax.f32 %v2003_v12, 1e-24  ;;  %v2001_v59 = vpop.xlane.xlu0 %2000 }
 0x377   :  { %v3131_v39 = vpop.eup %3130  ;;  %v2105_v43 = vmul.f32 %v3129_v10, %v4066_v21  ;;  %v2046_v17 = vmax.f32 %v2001_v59, 1e-24 }
 0x378   :  { %v2104_v53 = vmul.f32 %v3131_v39, %v4069_v47  ;;  %3140 = vrsqrt.f32 %v2047_v51 }
 0x379   :  { %2137 = vst [vmem:[#allocation14 + $0x68] sm:$0xff] %v2105_v43  ;;  %3142 = vrsqrt.f32 %v2046_v17  ;;  %v2007_v52 = vpop.xlane.xlu1 %2006 }
 0x37a   :  { %v3133_v8 = vpop.eup %3132  ;;  %2136 = vst [vmem:[#allocation14 + $0x60] sm:$0xff] %v2104_v53  ;;  %v2049_v26 = vmax.f32 %v2007_v52, 1e-24  ;;  %v2005_v62 = vpop.xlane.xlu0 %2004 }
 0x37b   :  { %v3135_v55 = vpop.eup %3134  ;;  %v2107_v15 = vmul.f32 %v3133_v8, %v4352_v50  ;;  %v2048_v20 = vmax.f32 %v2005_v62, 1e-24 }
 0x37c   :  { %v2106_v44 = vmul.f32 %v3135_v55, %v4081_v42  ;;  %3144 = vrsqrt.f32 %v2049_v26 }
 0x37d   :  { %2139 = vst [vmem:[#allocation14 + $0x78] sm:$0xff] %v2107_v15  ;;  %3146 = vrsqrt.f32 %v2048_v20  ;;  %v2011_v21 = vpop.xlane.xlu1 %2010 }
 0x37e   :  { %v3137_v61 = vpop.eup %3136  ;;  %2138 = vst [vmem:[#allocation14 + $0x70] sm:$0xff] %v2106_v44  ;;  %v2051_v47 = vmax.f32 %v2011_v21, 1e-24  ;;  %v2009_v3 = vpop.xlane.xlu0 %2008 }
 0x37f   :  { %v3139_v63 = vpop.eup %3138  ;;  %v2109_v13 = vmul.f32 %v3137_v61, %v4090_v27  ;;  %v2050_v30 = vmax.f32 %v2009_v3, 1e-24 }
 0x380   :  { %v2108_v16 = vmul.f32 %v3139_v63, %v4093_v40  ;;  %3148 = vrsqrt.f32 %v2051_v47 }
 0x381   :  { %2141 = vst [vmem:[#allocation14 + $0x88] sm:$0xff] %v2109_v13  ;;  %3150 = vrsqrt.f32 %v2050_v30  ;;  %v2015_v29 = vpop.xlane.xlu1 %2014 }
 0x382   :  { %v3141_v2 = vpop.eup %3140  ;;  %2140 = vst [vmem:[#allocation14 + $0x80] sm:$0xff] %v2108_v16  ;;  %v2053_v42 = vmax.f32 %v2015_v29, 1e-24  ;;  %v2013_v56 = vpop.xlane.xlu0 %2012 }
 0x383   :  { %v3143_v5 = vpop.eup %3142  ;;  %v2111_v38 = vmul.f32 %v3141_v2, %v4103_v37  ;;  %v2052_v41 = vmax.f32 %v2013_v56, 1e-24 }
 0x384   :  { %v2110_v11 = vmul.f32 %v3143_v5, %v4106_v57  ;;  %3152 = vrsqrt.f32 %v2053_v42 }
 0x385   :  { %2143 = vst [vmem:[#allocation14 + $0x98] sm:$0xff] %v2111_v38  ;;  %3154 = vrsqrt.f32 %v2052_v41  ;;  %v2019_v27 = vpop.xlane.xlu1 %2018 }
 0x386   :  { %v3145_v58 = vpop.eup %3144  ;;  %2142 = vst [vmem:[#allocation14 + $0x90] sm:$0xff] %v2110_v11  ;;  %v2055_v40 = vmax.f32 %v2019_v27, 1e-24  ;;  %v2017_v33 = vpop.xlane.xlu0 %2016 }
 0x387   :  { %v3147_v1 = vpop.eup %3146  ;;  %v2113_v35 = vmul.f32 %v3145_v58, %v4116_v48  ;;  %v2054_v19 = vmax.f32 %v2017_v33, 1e-24 }
 0x388   :  { %v2112_v23 = vmul.f32 %v3147_v1, %v4119_v28  ;;  %3156 = vrsqrt.f32 %v2055_v40 }
 0x389   :  { %2145 = vst [vmem:[#allocation14 + $0xa8] sm:$0xff] %v2113_v35  ;;  %3158 = vrsqrt.f32 %v2054_v19  ;;  %v2023_v37 = vpop.xlane.xlu1 %2022 }
 0x38a   :  { %v3149_v36 = vpop.eup %3148  ;;  %2144 = vst [vmem:[#allocation14 + $0xa0] sm:$0xff] %v2112_v23  ;;  %v2057_v57 = vmax.f32 %v2023_v37, 1e-24  ;;  %v2021_v34 = vpop.xlane.xlu0 %2020 }
 0x38b   :  { %v3151_v45 = vpop.eup %3150  ;;  %v2115_v7 = vmul.f32 %v3149_v36, %v4129_v32  ;;  %v2056_v24 = vmax.f32 %v2021_v34, 1e-24 }
 0x38c   :  { %v2114_v54 = vmul.f32 %v3151_v45, %v4132_v0  ;;  %3160 = vrsqrt.f32 %v2057_v57 }
 0x38d   :  { %2147 = vst [vmem:[#allocation14 + $0xb8] sm:$0xff] %v2115_v7  ;;  %3162 = vrsqrt.f32 %v2056_v24  ;;  %v2027_v48 = vpop.xlane.xlu1 %2026 }
 0x38e   :  { %v3153_v46 = vpop.eup %3152  ;;  %2146 = vst [vmem:[#allocation14 + $0xb0] sm:$0xff] %v2114_v54  ;;  %v2059_v28 = vmax.f32 %v2027_v48, 1e-24  ;;  %v2025_v18 = vpop.xlane.xlu0 %2024 }
 0x38f   :  { %v3155_v25 = vpop.eup %3154  ;;  %v2117_v12 = vmul.f32 %v3153_v46, %v4142_v49  ;;  %v2058_v10 = vmax.f32 %v2025_v18, 1e-24 }
 0x390   :  { %v2116_v51 = vmul.f32 %v3155_v25, %v4145_v22  ;;  %3164 = vrsqrt.f32 %v2059_v28 }
 0x391   :  { %2149 = vst [vmem:[#allocation14 + $0xc8] sm:$0xff] %v2117_v12  ;;  %3166 = vrsqrt.f32 %v2058_v10 }
 0x392   :  { %v3157_v32 = vpop.eup %3156  ;;  %2148 = vst [vmem:[#allocation14 + $0xc0] sm:$0xff] %v2116_v51 }
 0x393   :  { %v3159_v0 = vpop.eup %3158  ;;  %v2119_v59 = vmul.f32 %v3157_v32, %v4156_v6 }
 0x394   :  { %v2118_v39 = vmul.f32 %v3159_v0, %v4159_v31 }
 0x395   :  { %2151 = vst [vmem:[#allocation14 + $0xd8] sm:$0xff] %v2119_v59 }
 0x396   :  { %v3161_v43 = vpop.eup %3160  ;;  %2150 = vst [vmem:[#allocation14 + $0xd0] sm:$0xff] %v2118_v39 }
 0x397   :  { %v3163_v17 = vpop.eup %3162  ;;  %v2121_v53 = vmul.f32 %v3161_v43, %v4168_v14 }
 0x398   :  { %v2120_v49 = vmul.f32 %v3163_v17, %v4171_v9 }
 0x399   :  { %2153 = vst [vmem:[#allocation14 + $0xe8] sm:$0xff] %v2121_v53 }
 0x39a   :  { %v3165_v22 = vpop.eup %3164  ;;  %2152 = vst [vmem:[#allocation14 + $0xe0] sm:$0xff] %v2120_v49 }
 0x39b   :  { %v3167_v52 = vpop.eup %3166  ;;  %v2123_v8 = vmul.f32 %v3165_v22, %v4182_v4 }
 0x39c   :  { %v2122_v6 = vmul.f32 %v3167_v52, %v4185_v60 }
 0x39d   :  { %2155 = vst [vmem:[#allocation14 + $0xf8] sm:$0xff] %v2123_v8 }
 0x39e   :  { %2154 = vst [vmem:[#allocation14 + $0xf0] sm:$0xff] %v2122_v6 }
 0x39f   :  { %3333 = shalt.err (!%p3330_p4)
}
 0x3a0   :  { %s3334_s1 = scalar_lea.hbm %s4286_s9, 4096 }
 0x3a1   :  { %p3335_p5 = scmp.ne.s32.totalorder %s4286_s9, %s3334_s1  ;;  %p3338_p6 = scmp.lt.u32.totalorder %s3334_s1, %s4286_s9 }
 0x3a3   :  { %p3340_p7 = pnand %p3338_p6, %p3335_p5 }
 0x3a5   :  { %3343 = shalt.err (!%p3340_p7)
}
 0x3a6   :  { %2179 = dma.vmem_to_hbm [thread:$0]  %s2174_s29, 4096, %s4286_s9, [#allocation15], %s3361_s10, %s3361_s10, %s3362_s14  }
 0x3a7   :  { %3352 = dma.done.wait [#allocation4], 4096  }
 0x3a8   :  { %3353 = vsyncadd [#allocation4], 4294963200 }
 0x3a9   :  { %3354 = dma.done.wait [#allocation15], 4096  }
 0x3aa   :  { %3355 = vsyncadd [#allocation15], 4294963200 }
 0x3ab   :  { %2186 = vsyncpa [#allocation3], 1 }
 0x3ac   :  { %2187 = vsyncpa [#allocation6], 1 }
 0x3ad   :  { %2188 = vsyncpa [#allocation9], 1 }
 0x3ae   :  { %2189 = vsyncpa [#allocation12], 1 }
 0x3af   :  { %2190 = vsyncpa [#allocation4], 1 }
 0x3b0   :  { %2191 = vsyncpa [#allocation15], 1 }

</bundles_post_ra>
